<compile_context>
chip_gen: v7x
topology: tpu7x:2x2x1
jax: 0.10.0
libtpu: 0.0.40
codegen_flags: <defaults>
</compile_context>

<pallas_src>
import functools

import jax
import jax.numpy as jnp
import numpy as np
from jax import lax
from jax.experimental import pallas as pl
from jax.experimental.pallas import tpu as pltpu

EPS = 1e-6


def _round_up(x, m):
    return ((x + m - 1) // m) * m


def _device_kind():
    try:
        return jax.devices()[0].device_kind.lower()
    except Exception:  # pragma: no cover - defensive
        return ""


def _auto_tail_dtype():
    """bf16 elementwise tail only where the EUP/VPU have bf16 paths (v6e/v7x)."""
    kind = _device_kind()
    if any(tag in kind for tag in ("v6", "v7", "7x")):
        return jnp.bfloat16
    return jnp.float32


def _default_tiles(nq, ng, k, d):
    """Tile sizes in *items*.

    - Query tile: q-side inputs are tiny, so grow tile_q until tile_q*K ~ 512
      rows (bounded by ~4 MiB of streamed q features).
    - Gallery tile: always a lane-dense multiple of 128 items; sized so the
      per-sample (tile_q*K, tile_g) f32 slabs stay around ~1 MiB and the
      streamed (K, tile_g, D) gallery tile stays ~<=6 MiB (double-buffered).
    - Keep >=2 grid programs when possible (prefer splitting the gallery axis)
      so v7x's two TensorCores both get work.
    """
    max_tqk_rows = max(8, min(512, (4 * 1024 * 1024) // max(4 * d, 1)))
    tile_q = min(_round_up(nq, 8),
                 max(8, _round_up(max_tqk_rows // max(k, 1), 8)))
    tqk = tile_q * k

    by_slab = (256 * 1024) // max(tqk, 1)                 # tqk*tile_g <= 256K elems
    by_g_input = (6 * 1024 * 1024) // max(4 * k * d, 1)   # K*tile_g*D*4 <= 6 MiB
    max_groups = max(1, min(by_slab, by_g_input) // 128)
    groups = max(1, min(_round_up(ng, 128) // 128, max_groups))
    tile_g = 128 * groups

    n_q_tiles = _round_up(nq, tile_q) // tile_q
    n_g_tiles = _round_up(ng, tile_g) // tile_g
    if n_q_tiles == 1 and n_g_tiles == 1 and groups > 1:
        groups = max(1, groups // 2)      # split gallery so v7x megacore engages
        tile_g = 128 * groups
    return tile_q, tile_g


def _vmem_limit_bytes(tile_q, tile_g, k, d, tail_bytes, device_kind):
    """Gen-gated scoped-VMEM request from an explicit residency estimate."""
    tqk = tile_q * k
    stream = 2 * (tqk * d * 4            # q tile (double-buffered)
                  + k * tile_g * d * 4   # g tile
                  + tqk * 4              # ||q||^2
                  + k * tile_g * 4       # ||g||^2 (+eps)
                  + tile_q * tqk * tail_bytes   # pool_q
                  + tile_q * tile_g * 4)        # output tile
    interm = 6 * tqk * tile_g * 4        # dot / sq / dist / tanh / acc slabs (generous)
    est = stream + interm + (2 << 20)
    if ("v7" in device_kind) or ("7x" in device_kind):
        cap = 48 << 20                   # 64 MiB physical per TC on v7x -> headroom
    else:
        cap = 100 << 20                  # 128 MiB physical on v5e / v6e
    return int(min(cap, max(est, 16 << 20)))


def _match_prob_kernel(q_ref, g_ref, qsq_ref, gsq_ref, poolq_ref,
                       shift_ref, eps_ref, out_ref, *, tail_dtype):
    """One (tile_q, tile_g) output block.

    q_ref    : (tile_q*K, D)      query samples, pre-scaled by -2*c   (f32)
    g_ref    : (K, tile_g, D)     gallery samples (sample-major), *c  (f32)
    qsq_ref  : (tile_q*K, 1)      c^2 * ||q||^2                       (f32)
    gsq_ref  : (K, 1, tile_g)     c^2 * ||g||^2 + c^2*EPS             (f32)
    poolq_ref: (tile_q, tile_q*K) query-side block-sum matrix, entries 1.0
    shift_ref, eps_ref : (1, 1)   SMEM scalars (0.5*shift, c^2*EPS)
    out_ref  : (tile_q, tile_g)   f32
    where c = 0.5 * negative_scale.
    """
    k = g_ref.shape[0]
    shift_t = shift_ref[0, 0].astype(tail_dtype)
    eps = eps_ref[0, 0]

    q = q_ref[...]                     # hoisted: reused for every gallery sample
    qsq = qsq_ref[...]

    dn_ff = (((1,), (1,)), ((), ()))   # contract the feature dims (no transpose)
    acc = None
    for s in range(k):                 # K is small & static -> unrolled
        dot = lax.dot_general(q, g_ref[s], dn_ff,
                              preferred_element_type=jnp.float32)   # (TQK, TG)
        # max(a + eps', eps') == max(a, 0) + eps'  -> one clamp, eps pre-folded.
        sq = jnp.maximum(dot + qsq + gsq_ref[s], eps)                # f32
        # bf16 tail on v6e/v7x (gen-gated in the wrapper); f32 elsewhere.
        t = jnp.tanh(shift_t - jnp.sqrt(sq.astype(tail_dtype)))
        acc = t if acc is None else acc + t     # gallery-side mean: K slab adds

    # Query-side pooling: tiny (tile_q, TQK) x (TQK, tile_g) matmul, entries 1.0
    # (exact in bf16); the 0.5/K^2 mean factor and the +0.5 of the sigmoid->tanh
    # identity are applied on the small (tile_q, tile_g) output only.
    dn_std = (((1,), (0,)), ((), ()))
    pooled = lax.dot_general(poolq_ref[...], acc, dn_std,
                             preferred_element_type=jnp.float32)     # (TQ, TG)
    out_ref[...] = 0.5 + (0.5 / (k * k)) * pooled


@functools.partial(jax.jit,
                   static_argnames=("tile_q", "tile_g", "tail_dtype", "vmem_limit"))
def _matching_prob_forward(q_features, g_features, negative_scale, shift, *,
                           tile_q, tile_g, tail_dtype, vmem_limit):
    nq, k, d = q_features.shape
    ng = g_features.shape[0]
    nq_pad = _round_up(nq, tile_q)
    ng_pad = _round_up(ng, tile_g)

    qf = q_features.astype(jnp.float32)
    gf = g_features.astype(jnp.float32)
    if nq_pad != nq:
        qf = jnp.pad(qf, ((0, nq_pad - nq), (0, 0), (0, 0)))
    if ng_pad != ng:
        gf = jnp.pad(gf, ((0, ng_pad - ng), (0, 0), (0, 0)))

    # Constant folding:  sigmoid(shift - scale*dist) = 0.5 + 0.5*tanh(c_shift - c*dist)
    # with c = 0.5*scale, and c*dist = sqrt(c^2 * (sq_dist + EPS)).
    c = 0.5 * negative_scale
    c2 = c * c

    q_dot = (qf * (-2.0 * c)).reshape(nq_pad * k, d)            # rows item-major
    g_dot = jnp.transpose(gf * c, (1, 0, 2))                    # (K, NGp, D) sample-major
    q_sq = (c2 * jnp.sum(qf * qf, axis=-1)).reshape(nq_pad * k, 1)
    g_sq = c2 * jnp.sum(gf * gf, axis=-1) + c2 * EPS            # (NGp, K), eps folded in
    g_sq = jnp.transpose(g_sq, (1, 0))[:, None, :]              # (K, 1, NGp)

    shift_arr = jnp.reshape(0.5 * shift, (1, 1)).astype(jnp.float32)
    eps_arr = jnp.reshape(c2 * EPS, (1, 1)).astype(jnp.float32)

    # Tile-local query-side block-sum matrix (entries exactly 1.0 -> exact in bf16).
    pool_q = jnp.kron(jnp.eye(tile_q, dtype=jnp.float32),
                      jnp.ones((1, k), jnp.float32)).astype(tail_dtype)

    tqk = tile_q * k
    grid = (nq_pad // tile_q, ng_pad // tile_g)
    smem = pltpu.MemorySpace.SMEM
    kernel = functools.partial(_match_prob_kernel, tail_dtype=tail_dtype)

    sims = pl.pallas_call(
        kernel,
        out_shape=jax.ShapeDtypeStruct((nq_pad, ng_pad), jnp.float32),
        grid=grid,
        in_specs=[
            pl.BlockSpec((tqk, d), lambda i, j: (i, 0)),            # q tile (-2c * q)
            pl.BlockSpec((k, tile_g, d), lambda i, j: (0, j, 0)),   # g tile (c * g)
            pl.BlockSpec((tqk, 1), lambda i, j: (i, 0)),            # c^2 ||q||^2
            pl.BlockSpec((k, 1, tile_g), lambda i, j: (0, 0, j)),   # c^2 ||g||^2 + eps
            pl.BlockSpec((tile_q, tqk), lambda i, j: (0, 0)),       # pool_q (tiny const)
            pl.BlockSpec((1, 1), lambda i, j: (0, 0), memory_space=smem),  # 0.5*shift
            pl.BlockSpec((1, 1), lambda i, j: (0, 0), memory_space=smem),  # c^2*EPS
        ],
        out_specs=pl.BlockSpec((tile_q, tile_g), lambda i, j: (i, j)),
        compiler_params=pltpu.CompilerParams(
            dimension_semantics=("parallel", "parallel"),
            vmem_limit_bytes=vmem_limit),
    )(q_dot, g_dot, q_sq, g_sq, pool_q, shift_arr, eps_arr)

    sims = sims[:nq, :ng]

    # torch: sims, pred_ranks = (-sims).sort() -> one multi-operand XLA sort gives
    # both sorted values and indices.  (Full sort kept for torch parity; use
    # lax.top_k here instead if only the top-R ranks are needed downstream.)
    neg = -sims
    idx = lax.broadcasted_iota(jnp.int32, neg.shape, 1)
    neg_sorted, pred_ranks = lax.sort((neg, idx), dimension=-1,
                                      is_stable=True, num_keys=1)
    return neg_sorted, pred_ranks  # pred_ranks int32 (torch returns int64)


def matching_prob_forward(q_features, g_features, negative_scale, shift, *,
                          tile_q=None, tile_g=None, tail_dtype=None):
    """Pallas implementation of MatchingProbModule.forward.

    q_features: (NQ, K, D), g_features: (NG, K, D) float32.
    Returns (sorted_neg_sims, pred_ranks) like the PyTorch module.
    """
    nq, k, d = q_features.shape
    ng, kg, dg = g_features.shape
    assert (k, d) == (kg, dg)

    if tail_dtype is None:
        tail_dtype = _auto_tail_dtype()
    tail_dtype = jnp.dtype(tail_dtype)

    if tile_q is None or tile_g is None:
        dtq, dtg = _default_tiles(nq, ng, k, d)
        tile_q = dtq if tile_q is None else tile_q
        tile_g = dtg if tile_g is None else tile_g

    nq_pad = _round_up(nq, tile_q)
    assert tile_g % 128 == 0, "gallery tile must be lane-dense (multiple of 128 items)"
    assert tile_q % 8 == 0 or nq_pad == tile_q

    vmem_limit = _vmem_limit_bytes(tile_q, tile_g, k, d, tail_dtype.itemsize,
                                   _device_kind())
    return _matching_prob_forward(
        q_features, g_features,
        jnp.asarray(negative_scale, jnp.float32), jnp.asarray(shift, jnp.float32),
        tile_q=int(tile_q), tile_g=int(tile_g),
        tail_dtype=tail_dtype, vmem_limit=int(vmem_limit))


def _reference_sims(q_features, g_features, negative_scale, shift):
    """Pure-JAX reference replicating the PyTorch loop / batchwise_cdist math."""
    diff = q_features[:, None, :, None, :] - g_features[None, :, None, :, :]
    dist = jnp.sqrt(jnp.sum(diff * diff, axis=-1) + EPS)     # (NQ, NG, K, K)
    prob = jax.nn.sigmoid(-negative_scale * dist + shift)
    return prob.reshape(prob.shape[0], prob.shape[1], -1).mean(axis=-1)


if __name__ == "__main__":
    # Small but tiled shapes: NQ query items, NG gallery items, K samples, D dims.
    NQ, NG, K, D = 16, 256, 4, 32     # default tiles -> tile_q=16, tile_g=128, grid (1,2)

    key = jax.random.PRNGKey(0)
    kq, kg = jax.random.split(key)
    q_features = 0.2 * jax.random.normal(kq, (NQ, K, D), dtype=jnp.float32)
    g_features = 0.2 * jax.random.normal(kg, (NG, K, D), dtype=jnp.float32)

    negative_scale = 5.0   # PCME init_negative_scale
    shift = 5.0            # PCME init_shift

    ref_sims = np.asarray(_reference_sims(q_features, g_features,
                                          negative_scale, shift))
    ref_neg = -ref_sims
    ref_sorted = np.sort(ref_neg, axis=-1)

    # ---- f32 elementwise tail (strict value + rank checks) ------------------
    neg_sorted, pred_ranks = jax.block_until_ready(
        matching_prob_forward(q_features, g_features, negative_scale, shift,
                              tail_dtype=jnp.float32))

    np.testing.assert_allclose(np.asarray(neg_sorted), ref_sorted,
                               rtol=2e-4, atol=2e-5)
    ranks_np = np.asarray(pred_ranks)
    # ranks must be a permutation of the gallery indices per query ...
    np.testing.assert_array_equal(np.sort(ranks_np, axis=-1),
                                  np.broadcast_to(np.arange(NG), (NQ, NG)))
    # ... and gathering the reference (-sims) with them must reproduce the
    # sorted sequence (tie-robust rank correctness check).
    gathered = np.take_along_axis(ref_neg, ranks_np, axis=-1)
    np.testing.assert_allclose(gathered, ref_sorted, rtol=2e-4, atol=2e-5)

    # ---- generation-gated path (bf16 elementwise tail on v6e/v7x) -----------
    # bf16 rounding may legitimately flip rank ties, so only sorted similarity
    # values (loose tolerance) and rank-permutation validity are checked here.
    neg_sorted_auto, pred_ranks_auto = jax.block_until_ready(
        matching_prob_forward(q_features, g_features, negative_scale, shift))
    np.testing.assert_allclose(np.asarray(neg_sorted_auto), ref_sorted,
                               rtol=5e-2, atol=1e-2)
    np.testing.assert_array_equal(np.sort(np.asarray(pred_ranks_auto), axis=-1),
                                  np.broadcast_to(np.arange(NG), (NQ, NG)))

    print("KERNEL_OK")
</pallas_src>

<mosaic_0001>
module attributes {stable_mosaic.version = 11 : i64} {
  func.func @_match_prob_kernel(%arg0: i32, %arg1: i32, %arg2: memref<64x32xf32, #tpu.memory_space<vmem>>, %arg3: memref<4x128x32xf32, #tpu.memory_space<vmem>>, %arg4: memref<64x1xf32, #tpu.memory_space<vmem>>, %arg5: memref<4x1x128xf32, #tpu.memory_space<vmem>>, %arg6: memref<16x64xf32, #tpu.memory_space<vmem>>, %arg7: memref<1x1xf32, #tpu.memory_space<smem>>, %arg8: memref<1x1xf32, #tpu.memory_space<smem>>, %arg9: memref<16x128xf32, #tpu.memory_space<vmem>>) attributes {dimension_semantics = [#tpu.dimension_semantics<parallel>, #tpu.dimension_semantics<parallel>], iteration_bounds = array<i64: 1, 2>, scalar_prefetch = 0 : i64, scratch_operands = 0 : i64, tpu.core_type = #tpu.core_type<tc>, window_params = [{transform_indices = @transform_0, window_bounds = array<i64: 64, 32>}, {transform_indices = @transform_1, window_bounds = array<i64: 4, 128, 32>}, {transform_indices = @transform_2, window_bounds = array<i64: 64, 1>}, {transform_indices = @transform_3, window_bounds = array<i64: 4, 1, 128>}, {pipeline_mode = #tpu.pipeline_mode<synchronous>, transform_indices = @transform_4, window_bounds = array<i64: 16, 64>}, {transform_indices = @transform_5, window_bounds = array<i64: 1, 1>}, {transform_indices = @transform_6, window_bounds = array<i64: 1, 1>}, {transform_indices = @transform_7, window_bounds = array<i64: 16, 128>}]} {
    %c0 = arith.constant 0 : index
    %c0_0 = arith.constant 0 : index
    %0 = memref.load %arg7[%c0, %c0_0] : memref<1x1xf32, #tpu.memory_space<smem>>
    %c0_1 = arith.constant 0 : index
    %c0_2 = arith.constant 0 : index
    %1 = memref.load %arg8[%c0_1, %c0_2] : memref<1x1xf32, #tpu.memory_space<smem>>
    %c0_3 = arith.constant 0 : index
    %c0_4 = arith.constant 0 : index
    %2 = vector.load %arg2[%c0_3, %c0_4] : memref<64x32xf32, #tpu.memory_space<vmem>>, vector<64x32xf32>
    %c0_5 = arith.constant 0 : index
    %c0_6 = arith.constant 0 : index
    %3 = vector.load %arg4[%c0_5, %c0_6] : memref<64x1xf32, #tpu.memory_space<vmem>>, vector<64x1xf32>
    %c0_7 = arith.constant 0 : index
    %c0_8 = arith.constant 0 : index
    %c0_9 = arith.constant 0 : index
    %4 = vector.load %arg3[%c0_7, %c0_8, %c0_9] : memref<4x128x32xf32, #tpu.memory_space<vmem>>, vector<1x128x32xf32>
    %5 = vector.shape_cast %4 : vector<1x128x32xf32> to vector<128x32xf32>
    %cst = arith.constant dense<0.000000e+00> : vector<64x128xf32>
    %6 = tpu.matmul %2, %5, %cst {dimension_numbers = #tpu.dot_dimension_numbers<[1], [1], [0], [0], [0, 0, 1, 0], [], []>} : vector<64x32xf32>, vector<128x32xf32>, vector<64x128xf32> -> vector<64x128xf32>
    %7 = vector.broadcast %3 : vector<64x1xf32> to vector<64x128xf32>
    %8 = arith.addf %6, %7 : vector<64x128xf32>
    %c0_10 = arith.constant 0 : index
    %c0_11 = arith.constant 0 : index
    %c0_12 = arith.constant 0 : index
    %9 = vector.load %arg5[%c0_10, %c0_11, %c0_12] : memref<4x1x128xf32, #tpu.memory_space<vmem>>, vector<1x1x128xf32>
    %10 = vector.shape_cast %9 : vector<1x1x128xf32> to vector<1x128xf32>
    %11 = vector.broadcast %10 : vector<1x128xf32> to vector<64x128xf32>
    %12 = arith.addf %8, %11 : vector<64x128xf32>
    %13 = vector.broadcast %1 : f32 to vector<64x128xf32>
    %14 = arith.maximumf %12, %13 : vector<64x128xf32>
    %15 = math.sqrt %14 : vector<64x128xf32>
    %16 = vector.broadcast %0 : f32 to vector<64x128xf32>
    %17 = arith.subf %16, %15 : vector<64x128xf32>
    %18 = math.tanh %17 : vector<64x128xf32>
    %c1 = arith.constant 1 : index
    %c0_13 = arith.constant 0 : index
    %c0_14 = arith.constant 0 : index
    %19 = vector.load %arg3[%c1, %c0_13, %c0_14] : memref<4x128x32xf32, #tpu.memory_space<vmem>>, vector<1x128x32xf32>
    %20 = vector.shape_cast %19 : vector<1x128x32xf32> to vector<128x32xf32>
    %cst_15 = arith.constant dense<0.000000e+00> : vector<64x128xf32>
    %21 = tpu.matmul %2, %20, %cst_15 {dimension_numbers = #tpu.dot_dimension_numbers<[1], [1], [0], [0], [0, 0, 1, 0], [], []>} : vector<64x32xf32>, vector<128x32xf32>, vector<64x128xf32> -> vector<64x128xf32>
    %22 = vector.broadcast %3 : vector<64x1xf32> to vector<64x128xf32>
    %23 = arith.addf %21, %22 : vector<64x128xf32>
    %c1_16 = arith.constant 1 : index
    %c0_17 = arith.constant 0 : index
    %c0_18 = arith.constant 0 : index
    %24 = vector.load %arg5[%c1_16, %c0_17, %c0_18] : memref<4x1x128xf32, #tpu.memory_space<vmem>>, vector<1x1x128xf32>
    %25 = vector.shape_cast %24 : vector<1x1x128xf32> to vector<1x128xf32>
    %26 = vector.broadcast %25 : vector<1x128xf32> to vector<64x128xf32>
    %27 = arith.addf %23, %26 : vector<64x128xf32>
    %28 = vector.broadcast %1 : f32 to vector<64x128xf32>
    %29 = arith.maximumf %27, %28 : vector<64x128xf32>
    %30 = math.sqrt %29 : vector<64x128xf32>
    %31 = vector.broadcast %0 : f32 to vector<64x128xf32>
    %32 = arith.subf %31, %30 : vector<64x128xf32>
    %33 = math.tanh %32 : vector<64x128xf32>
    %34 = arith.addf %18, %33 : vector<64x128xf32>
    %c2 = arith.constant 2 : index
    %c0_19 = arith.constant 0 : index
    %c0_20 = arith.constant 0 : index
    %35 = vector.load %arg3[%c2, %c0_19, %c0_20] : memref<4x128x32xf32, #tpu.memory_space<vmem>>, vector<1x128x32xf32>
    %36 = vector.shape_cast %35 : vector<1x128x32xf32> to vector<128x32xf32>
    %cst_21 = arith.constant dense<0.000000e+00> : vector<64x128xf32>
    %37 = tpu.matmul %2, %36, %cst_21 {dimension_numbers = #tpu.dot_dimension_numbers<[1], [1], [0], [0], [0, 0, 1, 0], [], []>} : vector<64x32xf32>, vector<128x32xf32>, vector<64x128xf32> -> vector<64x128xf32>
    %38 = vector.broadcast %3 : vector<64x1xf32> to vector<64x128xf32>
    %39 = arith.addf %37, %38 : vector<64x128xf32>
    %c2_22 = arith.constant 2 : index
    %c0_23 = arith.constant 0 : index
    %c0_24 = arith.constant 0 : index
    %40 = vector.load %arg5[%c2_22, %c0_23, %c0_24] : memref<4x1x128xf32, #tpu.memory_space<vmem>>, vector<1x1x128xf32>
    %41 = vector.shape_cast %40 : vector<1x1x128xf32> to vector<1x128xf32>
    %42 = vector.broadcast %41 : vector<1x128xf32> to vector<64x128xf32>
    %43 = arith.addf %39, %42 : vector<64x128xf32>
    %44 = vector.broadcast %1 : f32 to vector<64x128xf32>
    %45 = arith.maximumf %43, %44 : vector<64x128xf32>
    %46 = math.sqrt %45 : vector<64x128xf32>
    %47 = vector.broadcast %0 : f32 to vector<64x128xf32>
    %48 = arith.subf %47, %46 : vector<64x128xf32>
    %49 = math.tanh %48 : vector<64x128xf32>
    %50 = arith.addf %34, %49 : vector<64x128xf32>
    %c3 = arith.constant 3 : index
    %c0_25 = arith.constant 0 : index
    %c0_26 = arith.constant 0 : index
    %51 = vector.load %arg3[%c3, %c0_25, %c0_26] : memref<4x128x32xf32, #tpu.memory_space<vmem>>, vector<1x128x32xf32>
    %52 = vector.shape_cast %51 : vector<1x128x32xf32> to vector<128x32xf32>
    %cst_27 = arith.constant dense<0.000000e+00> : vector<64x128xf32>
    %53 = tpu.matmul %2, %52, %cst_27 {dimension_numbers = #tpu.dot_dimension_numbers<[1], [1], [0], [0], [0, 0, 1, 0], [], []>} : vector<64x32xf32>, vector<128x32xf32>, vector<64x128xf32> -> vector<64x128xf32>
    %54 = vector.broadcast %3 : vector<64x1xf32> to vector<64x128xf32>
    %55 = arith.addf %53, %54 : vector<64x128xf32>
    %c3_28 = arith.constant 3 : index
    %c0_29 = arith.constant 0 : index
    %c0_30 = arith.constant 0 : index
    %56 = vector.load %arg5[%c3_28, %c0_29, %c0_30] : memref<4x1x128xf32, #tpu.memory_space<vmem>>, vector<1x1x128xf32>
    %57 = vector.shape_cast %56 : vector<1x1x128xf32> to vector<1x128xf32>
    %58 = vector.broadcast %57 : vector<1x128xf32> to vector<64x128xf32>
    %59 = arith.addf %55, %58 : vector<64x128xf32>
    %60 = vector.broadcast %1 : f32 to vector<64x128xf32>
    %61 = arith.maximumf %59, %60 : vector<64x128xf32>
    %62 = math.sqrt %61 : vector<64x128xf32>
    %63 = vector.broadcast %0 : f32 to vector<64x128xf32>
    %64 = arith.subf %63, %62 : vector<64x128xf32>
    %65 = math.tanh %64 : vector<64x128xf32>
    %66 = arith.addf %50, %65 : vector<64x128xf32>
    %c0_31 = arith.constant 0 : index
    %c0_32 = arith.constant 0 : index
    %67 = vector.load %arg6[%c0_31, %c0_32] : memref<16x64xf32, #tpu.memory_space<vmem>>, vector<16x64xf32>
    %cst_33 = arith.constant dense<0.000000e+00> : vector<16x128xf32>
    %68 = tpu.matmul %67, %66, %cst_33 {dimension_numbers = #tpu.dot_dimension_numbers<[1], [0], [0], [1], [0, 0, 1, 1], [], []>} : vector<16x64xf32>, vector<64x128xf32>, vector<16x128xf32> -> vector<16x128xf32>
    %cst_34 = arith.constant 3.125000e-02 : f32
    %69 = vector.broadcast %cst_34 : f32 to vector<16x128xf32>
    %70 = arith.mulf %69, %68 : vector<16x128xf32>
    %cst_35 = arith.constant 5.000000e-01 : f32
    %71 = vector.broadcast %cst_35 : f32 to vector<16x128xf32>
    %72 = arith.addf %71, %70 : vector<16x128xf32>
    %c0_36 = arith.constant 0 : index
    %c0_37 = arith.constant 0 : index
    %73 = vector.load %arg9[%c0_36, %c0_37] : memref<16x128xf32, #tpu.memory_space<vmem>>, vector<16x128xf32>
    tpu.vector_store %arg9[%c0_36, %c0_37], %72 {strides = array<i32>} : memref<16x128xf32, #tpu.memory_space<vmem>>, vector<16x128xf32>,
    return
  }
  func.func @transform_0(%arg0: i32, %arg1: i32) -> (i32, i32) {
    %c0_i32 = arith.constant 0 : i32
    %c0_i32_0 = arith.constant 0 : i32
    return %arg0, %c0_i32 : i32, i32
  }
  func.func @transform_1(%arg0: i32, %arg1: i32) -> (i32, i32, i32) {
    %c0_i32 = arith.constant 0 : i32
    %c0_i32_0 = arith.constant 0 : i32
    %c0_i32_1 = arith.constant 0 : i32
    return %c0_i32, %arg1, %c0_i32_0 : i32, i32, i32
  }
  func.func @transform_2(%arg0: i32, %arg1: i32) -> (i32, i32) {
    %c0_i32 = arith.constant 0 : i32
    %c0_i32_0 = arith.constant 0 : i32
    return %arg0, %c0_i32 : i32, i32
  }
  func.func @transform_3(%arg0: i32, %arg1: i32) -> (i32, i32, i32) {
    %c0_i32 = arith.constant 0 : i32
    %c0_i32_0 = arith.constant 0 : i32
    %c0_i32_1 = arith.constant 0 : i32
    return %c0_i32, %c0_i32_0, %arg1 : i32, i32, i32
  }
  func.func @transform_4(%arg0: i32, %arg1: i32) -> (i32, i32) {
    %c0_i32 = arith.constant 0 : i32
    %c0_i32_0 = arith.constant 0 : i32
    %c0_i32_1 = arith.constant 0 : i32
    return %c0_i32, %c0_i32_0 : i32, i32
  }
  func.func @transform_5(%arg0: i32, %arg1: i32) -> (i32, i32) {
    %c0_i32 = arith.constant 0 : i32
    %c0_i32_0 = arith.constant 0 : i32
    %c0_i32_1 = arith.constant 0 : i32
    return %c0_i32, %c0_i32_0 : i32, i32
  }
  func.func @transform_6(%arg0: i32, %arg1: i32) -> (i32, i32) {
    %c0_i32 = arith.constant 0 : i32
    %c0_i32_0 = arith.constant 0 : i32
    %c0_i32_1 = arith.constant 0 : i32
    return %c0_i32, %c0_i32_0 : i32, i32
  }
  func.func @transform_7(%arg0: i32, %arg1: i32) -> (i32, i32) {
    %c0_i32 = arith.constant 0 : i32
    return %arg0, %arg1 : i32, i32
  }
}

</mosaic_0001>

<bundles_post_ra>
// kernel: neg.1
= control target key start
LH: loop header
LB: loop body
LE: loop exit
PB: predicated region body
PF: predicated region fallthrough
CT: control target
= control target key end

     0   :  { %s72_s0 = inlined_call_operand.vmem [shape: f32[16,256], index: 0, kind: input, shape index: {}]   ;;  %s73_s1 = inlined_call_operand.vmem [shape: f32[16,256], index: 1, kind: output, shape index: {}]  }
   0x1   :  { %v2_v0 = vld [vmem:[%s72_s0] sm:$0xff]  ;;  %v32_v1 = vld [vmem:[%s72_s0 + $0x10] sm:$0xff]  ;;  %v34_v2 = vld [vmem:[%s72_s0 + $0x8] sm:$0xff] }
   0x2   :  { %v5_v3 = vxor.u32 2147483648, %v2_v0  ;;  %v12_v4 = vxor.u32 2147483648, %v32_v1  ;;  %v20_v5 = vxor.u32 2147483648, %v34_v2  ;;  %v36_v6 = vld [vmem:[%s72_s0 + $0x18] sm:$0xff] }
   0x3   :  { %v28_v7 = vxor.u32 2147483648, %v36_v6 }
   0x4   :  { %7 = vst [vmem:[%s73_s1] sm:$0xff] %v5_v3  ;;  %33 = vst [vmem:[%s73_s1 + $0x10] sm:$0xff] %v12_v4 }
   0x5   :  { %35 = vst [vmem:[%s73_s1 + $0x8] sm:$0xff] %v20_v5  ;;  %37 = vst [vmem:[%s73_s1 + $0x18] sm:$0xff] %v28_v7 }

// kernel: _matching_prob_forward.1
= control target key start
LH: loop header
LB: loop body
LE: loop exit
PB: predicated region body
PF: predicated region fallthrough
CT: control target
= control target key end

     0   :  { %s4195_s0 = inlined_call_operand.vmem [shape: f32[64,32], index: 0, kind: input, shape index: {}]   ;;  %s4196_s1 = inlined_call_operand.vmem [shape: f32[4,256,32], index: 1, kind: input, shape index: {}]   ;;  %s4197_s2 = inlined_call_operand.vmem [shape: f32[64,1], index: 2, kind: input, shape index: {}]   ;;  %s4198_s3 = inlined_call_operand.vmem [shape: f32[4,1,256], index: 3, kind: input, shape index: {}]   ;;  %s4199_s4 = inlined_call_operand.vmem [shape: f32[16,64], index: 4, kind: input, shape index: {}]   ;;  %s4200_s5 = inlined_call_operand.<no memory space> [shape: f32[1,1], index: 5, kind: input, shape index: {}]   ;;  %s4201_s6 = inlined_call_operand.<no memory space> [shape: f32[1,1], index: 6, kind: input, shape index: {}]   ;;  %s4202_s7 = inlined_call_operand.vmem [shape: f32[16,256], index: 7, kind: output, shape index: {}]  }
   0x1   :  { %12 = sst [smem:[#allocation2]] %s4200_s5 }
   0x2   :  { %13 = sst [smem:[#allocation3]] %s4201_s6 }
   0x3   :  { %s3048_s28 = smov 0   ;;  %s3050_s29 = smov 0  }
   0x4   :  { %s3052_s30 = smov 0   ;;  %s3054_s8 = smov 0  }
   0x5   :  { %s3056_s9 = smov 0  }
   0x6 LB: > { %s28_s5 = sadd.s32 1, %s2995_s8  ;;  %s2109_s6 = sadd.s32 4294967295, %s2999_s9   ;;  %s2999_s9 = sphi %s3056_s9, %s19_s9   ;;  %s2995_s8 = sphi %s3054_s8, %s4210_s8   ;;  %s2991_s30 = sphi %s3052_s30, %s4209_s30   ;;  %s2987_s29 = sphi %s3050_s29, %s4208_s29   ;;  %s2983_s28 = sphi %s3048_s28, %s4207_s28  }
   0x7   : > { %p29_p0 = scmp.ge.s32.totalorder %s28_s5, 2  ;;  %p71_p1 = scmp.ne.s32.totalorder %s2987_s29, %s2983_s28 }
   0x8   : > { %p72_p2 = scmp.eq.s32.totalorder %s2999_s9, 0  ;;  %p218_p4 = scmp.eq.s32.totalorder %s2109_s6, 1 }
   0x9   : > { %s4212_s5 = smov (%p29_p0, %s28_s5), 0  ;;  %s64_s12 = sadd.s32 1, %s2987_s29 }
   0xa   : > { %p3080_p3 = por %p72_p2, %p71_p1  ;;  %s61_s11 = ssub.s32 %s2995_s8, %s4212_s5 }
   0xb   : > { %p62_p5 = scmp.eq.s32.totalorder %s61_s11, 0  ;;  %p3087_p6 = por %p218_p4, %p71_p1 }
   0xc   : > { %p2114_p7 = scmp.ge.s32.totalorder %s2999_s9, 2 }
   0xd   : > { %s3092_s14 = scalar_select %p62_p5, %s2987_s29, %s64_s12  }
   0xe   : > { %267 = sbr.rel (%p2114_p7) target bundleno = 64 (0x40), region = 36 }
  0x15   : > { %270 = sbr.rel (!%p3080_p3) target bundleno = 57 (0x39), region = 40  ;;  %s272_s15 = sand.u32 (%p3080_p3), 1, %s2987_s29  }
  0x16   : > { %s2280_s16 = sshll.u32 (%p3080_p3), %s2995_s8, 7  ;;  %s2115_s17 = sshll.u32 (%p3080_p3), %s272_s15, 9 }
  0x17   : > { %s3102_s20 = scalar_lea.vmem (%p3080_p3), %s4196_s1, %s2280_s16  ;;  %s3107_s21 = scalar_lea.vmem (%p3080_p3), [#allocation4], %s2115_s17 }
  0x18   : > { %v431_v0 = vld [vmem:[%s3102_s20] sm:$0xff] (%p3080_p3)  ;;  %v433_v1 = vld [vmem:[%s3102_s20 + $0x8] sm:$0xff] (%p3080_p3)  ;;  %v435_v2 = vld [vmem:[%s3102_s20 + $0x10] sm:$0xff] (%p3080_p3) }
  0x19   : > { %432 = vst [vmem:[%s3107_s21] sm:$0xff] (%p3080_p3), %v431_v0  ;;  %434 = vst [vmem:[%s3107_s21 + $0x8] sm:$0xff] (%p3080_p3), %v433_v1  ;;  %v437_v3 = vld [vmem:[%s3102_s20 + $0x18] sm:$0xff] (%p3080_p3)  ;;  %v439_v4 = vld [vmem:[%s3102_s20 + $0x20] sm:$0xff] (%p3080_p3) }
  0x1a   : > { %436 = vst [vmem:[%s3107_s21 + $0x10] sm:$0xff] (%p3080_p3), %v435_v2  ;;  %v441_v5 = vld [vmem:[%s3102_s20 + $0x28] sm:$0xff] (%p3080_p3)  ;;  %438 = vst [vmem:[%s3107_s21 + $0x18] sm:$0xff] (%p3080_p3), %v437_v3  ;;  %v443_v6 = vld [vmem:[%s3102_s20 + $0x30] sm:$0xff] (%p3080_p3) }
  0x1b   : > { %440 = vst [vmem:[%s3107_s21 + $0x20] sm:$0xff] (%p3080_p3), %v439_v4  ;;  %442 = vst [vmem:[%s3107_s21 + $0x28] sm:$0xff] (%p3080_p3), %v441_v5  ;;  %v445_v7 = vld [vmem:[%s3102_s20 + $0x38] sm:$0xff] (%p3080_p3)  ;;  %v447_v8 = vld [vmem:[%s3102_s20 + $0x40] sm:$0xff] (%p3080_p3) }
  0x1c   : > { %444 = vst [vmem:[%s3107_s21 + $0x30] sm:$0xff] %v443_v6  ;;  %446 = vst [vmem:[%s3107_s21 + $0x38] sm:$0xff] %v445_v7  ;;  %v449_v9 = vld [vmem:[%s3102_s20 + $0x48] sm:$0xff]  ;;  %v451_v10 = vld [vmem:[%s3102_s20 + $0x50] sm:$0xff] }
  0x1d   : > { %448 = vst [vmem:[%s3107_s21 + $0x40] sm:$0xff] %v447_v8  ;;  %v453_v11 = vld [vmem:[%s3102_s20 + $0x58] sm:$0xff]  ;;  %450 = vst [vmem:[%s3107_s21 + $0x48] sm:$0xff] %v449_v9  ;;  %v455_v12 = vld [vmem:[%s3102_s20 + $0x60] sm:$0xff] }
  0x1e   : > { %452 = vst [vmem:[%s3107_s21 + $0x50] sm:$0xff] %v451_v10  ;;  %454 = vst [vmem:[%s3107_s21 + $0x58] sm:$0xff] %v453_v11  ;;  %v457_v13 = vld [vmem:[%s3102_s20 + $0x68] sm:$0xff]  ;;  %v459_v14 = vld [vmem:[%s3102_s20 + $0x70] sm:$0xff] }
  0x1f   : > { %456 = vst [vmem:[%s3107_s21 + $0x60] sm:$0xff] %v455_v12  ;;  %458 = vst [vmem:[%s3107_s21 + $0x68] sm:$0xff] %v457_v13  ;;  %v461_v15 = vld [vmem:[%s3102_s20 + $0x78] sm:$0xff]  ;;  %v463_v16 = vld [vmem:[%s3102_s20 + $0x100] sm:$0xff] }
  0x20   : > { %460 = vst [vmem:[%s3107_s21 + $0x70] sm:$0xff] %v459_v14  ;;  %v465_v17 = vld [vmem:[%s3102_s20 + $0x108] sm:$0xff]  ;;  %462 = vst [vmem:[%s3107_s21 + $0x78] sm:$0xff] %v461_v15  ;;  %v467_v18 = vld [vmem:[%s3102_s20 + $0x110] sm:$0xff] }
  0x21   : > { %464 = vst [vmem:[%s3107_s21 + $0x80] sm:$0xff] %v463_v16  ;;  %466 = vst [vmem:[%s3107_s21 + $0x88] sm:$0xff] %v465_v17  ;;  %v469_v19 = vld [vmem:[%s3102_s20 + $0x118] sm:$0xff]  ;;  %v471_v20 = vld [vmem:[%s3102_s20 + $0x120] sm:$0xff] }
  0x22   : > { %468 = vst [vmem:[%s3107_s21 + $0x90] sm:$0xff] %v467_v18  ;;  %470 = vst [vmem:[%s3107_s21 + $0x98] sm:$0xff] %v469_v19  ;;  %v473_v21 = vld [vmem:[%s3102_s20 + $0x128] sm:$0xff]  ;;  %v475_v22 = vld [vmem:[%s3102_s20 + $0x130] sm:$0xff] }
  0x23   : > { %472 = vst [vmem:[%s3107_s21 + $0xa0] sm:$0xff] %v471_v20  ;;  %v477_v23 = vld [vmem:[%s3102_s20 + $0x138] sm:$0xff]  ;;  %474 = vst [vmem:[%s3107_s21 + $0xa8] sm:$0xff] %v473_v21  ;;  %v479_v24 = vld [vmem:[%s3102_s20 + $0x140] sm:$0xff] }
  0x24   : > { %476 = vst [vmem:[%s3107_s21 + $0xb0] sm:$0xff] %v475_v22  ;;  %478 = vst [vmem:[%s3107_s21 + $0xb8] sm:$0xff] %v477_v23  ;;  %v481_v25 = vld [vmem:[%s3102_s20 + $0x148] sm:$0xff]  ;;  %v483_v26 = vld [vmem:[%s3102_s20 + $0x150] sm:$0xff] }
  0x25   : > { %480 = vst [vmem:[%s3107_s21 + $0xc0] sm:$0xff] %v479_v24  ;;  %482 = vst [vmem:[%s3107_s21 + $0xc8] sm:$0xff] %v481_v25  ;;  %v485_v27 = vld [vmem:[%s3102_s20 + $0x158] sm:$0xff]  ;;  %v487_v28 = vld [vmem:[%s3102_s20 + $0x160] sm:$0xff] }
  0x26   : > { %484 = vst [vmem:[%s3107_s21 + $0xd0] sm:$0xff] %v483_v26  ;;  %v489_v29 = vld [vmem:[%s3102_s20 + $0x168] sm:$0xff]  ;;  %486 = vst [vmem:[%s3107_s21 + $0xd8] sm:$0xff] %v485_v27  ;;  %v491_v30 = vld [vmem:[%s3102_s20 + $0x170] sm:$0xff] }
  0x27   : > { %488 = vst [vmem:[%s3107_s21 + $0xe0] sm:$0xff] %v487_v28  ;;  %490 = vst [vmem:[%s3107_s21 + $0xe8] sm:$0xff] %v489_v29  ;;  %v493_v31 = vld [vmem:[%s3102_s20 + $0x178] sm:$0xff]  ;;  %v495_v32 = vld [vmem:[%s3102_s20 + $0x200] sm:$0xff] }
  0x28   : > { %492 = vst [vmem:[%s3107_s21 + $0xf0] sm:$0xff] %v491_v30  ;;  %494 = vst [vmem:[%s3107_s21 + $0xf8] sm:$0xff] %v493_v31  ;;  %v497_v33 = vld [vmem:[%s3102_s20 + $0x208] sm:$0xff]  ;;  %v499_v34 = vld [vmem:[%s3102_s20 + $0x210] sm:$0xff] }
  0x29   : > { %496 = vst [vmem:[%s3107_s21 + $0x100] sm:$0xff] %v495_v32  ;;  %v501_v35 = vld [vmem:[%s3102_s20 + $0x218] sm:$0xff]  ;;  %498 = vst [vmem:[%s3107_s21 + $0x108] sm:$0xff] %v497_v33  ;;  %v503_v36 = vld [vmem:[%s3102_s20 + $0x220] sm:$0xff] }
  0x2a   : > { %500 = vst [vmem:[%s3107_s21 + $0x110] sm:$0xff] %v499_v34  ;;  %502 = vst [vmem:[%s3107_s21 + $0x118] sm:$0xff] %v501_v35  ;;  %v505_v37 = vld [vmem:[%s3102_s20 + $0x228] sm:$0xff]  ;;  %v507_v38 = vld [vmem:[%s3102_s20 + $0x230] sm:$0xff] }
  0x2b   : > { %504 = vst [vmem:[%s3107_s21 + $0x120] sm:$0xff] %v503_v36  ;;  %506 = vst [vmem:[%s3107_s21 + $0x128] sm:$0xff] %v505_v37  ;;  %v509_v39 = vld [vmem:[%s3102_s20 + $0x238] sm:$0xff]  ;;  %v511_v40 = vld [vmem:[%s3102_s20 + $0x240] sm:$0xff] }
  0x2c   : > { %508 = vst [vmem:[%s3107_s21 + $0x130] sm:$0xff] %v507_v38  ;;  %v513_v41 = vld [vmem:[%s3102_s20 + $0x248] sm:$0xff]  ;;  %510 = vst [vmem:[%s3107_s21 + $0x138] sm:$0xff] %v509_v39  ;;  %v515_v42 = vld [vmem:[%s3102_s20 + $0x250] sm:$0xff] }
  0x2d   : > { %512 = vst [vmem:[%s3107_s21 + $0x140] sm:$0xff] %v511_v40  ;;  %514 = vst [vmem:[%s3107_s21 + $0x148] sm:$0xff] %v513_v41  ;;  %v517_v43 = vld [vmem:[%s3102_s20 + $0x258] sm:$0xff]  ;;  %v519_v44 = vld [vmem:[%s3102_s20 + $0x260] sm:$0xff] }
  0x2e   : > { %516 = vst [vmem:[%s3107_s21 + $0x150] sm:$0xff] %v515_v42  ;;  %518 = vst [vmem:[%s3107_s21 + $0x158] sm:$0xff] %v517_v43  ;;  %v521_v45 = vld [vmem:[%s3102_s20 + $0x268] sm:$0xff]  ;;  %v523_v46 = vld [vmem:[%s3102_s20 + $0x270] sm:$0xff] }
  0x2f   : > { %520 = vst [vmem:[%s3107_s21 + $0x160] sm:$0xff] %v519_v44  ;;  %v525_v47 = vld [vmem:[%s3102_s20 + $0x278] sm:$0xff]  ;;  %522 = vst [vmem:[%s3107_s21 + $0x168] sm:$0xff] %v521_v45  ;;  %v527_v48 = vld [vmem:[%s3102_s20 + $0x300] sm:$0xff] }
  0x30   : > { %524 = vst [vmem:[%s3107_s21 + $0x170] sm:$0xff] %v523_v46  ;;  %526 = vst [vmem:[%s3107_s21 + $0x178] sm:$0xff] %v525_v47  ;;  %v529_v49 = vld [vmem:[%s3102_s20 + $0x308] sm:$0xff]  ;;  %v531_v50 = vld [vmem:[%s3102_s20 + $0x310] sm:$0xff] }
  0x31   : > { %528 = vst [vmem:[%s3107_s21 + $0x180] sm:$0xff] %v527_v48  ;;  %530 = vst [vmem:[%s3107_s21 + $0x188] sm:$0xff] %v529_v49  ;;  %v533_v51 = vld [vmem:[%s3102_s20 + $0x318] sm:$0xff]  ;;  %v535_v52 = vld [vmem:[%s3102_s20 + $0x320] sm:$0xff] }
  0x32   : > { %532 = vst [vmem:[%s3107_s21 + $0x190] sm:$0xff] %v531_v50  ;;  %v537_v53 = vld [vmem:[%s3102_s20 + $0x328] sm:$0xff]  ;;  %534 = vst [vmem:[%s3107_s21 + $0x198] sm:$0xff] %v533_v51  ;;  %v539_v54 = vld [vmem:[%s3102_s20 + $0x330] sm:$0xff] }
  0x33   : > { %536 = vst [vmem:[%s3107_s21 + $0x1a0] sm:$0xff] %v535_v52  ;;  %538 = vst [vmem:[%s3107_s21 + $0x1a8] sm:$0xff] %v537_v53  ;;  %v541_v55 = vld [vmem:[%s3102_s20 + $0x338] sm:$0xff]  ;;  %v543_v56 = vld [vmem:[%s3102_s20 + $0x340] sm:$0xff] }
  0x34   : > { %540 = vst [vmem:[%s3107_s21 + $0x1b0] sm:$0xff] %v539_v54  ;;  %542 = vst [vmem:[%s3107_s21 + $0x1b8] sm:$0xff] %v541_v55  ;;  %v545_v57 = vld [vmem:[%s3102_s20 + $0x348] sm:$0xff]  ;;  %v547_v58 = vld [vmem:[%s3102_s20 + $0x350] sm:$0xff] }
  0x35   : > { %544 = vst [vmem:[%s3107_s21 + $0x1c0] sm:$0xff] %v543_v56  ;;  %v549_v59 = vld [vmem:[%s3102_s20 + $0x358] sm:$0xff]  ;;  %546 = vst [vmem:[%s3107_s21 + $0x1c8] sm:$0xff] %v545_v57  ;;  %v551_v60 = vld [vmem:[%s3102_s20 + $0x360] sm:$0xff] }
  0x36   : > { %548 = vst [vmem:[%s3107_s21 + $0x1d0] sm:$0xff] %v547_v58  ;;  %550 = vst [vmem:[%s3107_s21 + $0x1d8] sm:$0xff] %v549_v59  ;;  %v553_v61 = vld [vmem:[%s3102_s20 + $0x368] sm:$0xff]  ;;  %v555_v62 = vld [vmem:[%s3102_s20 + $0x370] sm:$0xff] }
  0x37   : > { %552 = vst [vmem:[%s3107_s21 + $0x1e0] sm:$0xff] %v551_v60  ;;  %554 = vst [vmem:[%s3107_s21 + $0x1e8] sm:$0xff] %v553_v61  ;;  %v557_v63 = vld [vmem:[%s3102_s20 + $0x378] sm:$0xff] }
  0x38   : > { %556 = vst [vmem:[%s3107_s21 + $0x1f0] sm:$0xff] %v555_v62  ;;  %558 = vst [vmem:[%s3107_s21 + $0x1f8] sm:$0xff] %v557_v63 }
  0x39 PF: > { %564 = sbr.rel (!%p3080_p3) target bundleno = 64 (0x40), region = 78  ;;  %s566_s22 = sand.u32 (%p3080_p3), 1, %s2987_s29  }
  0x3a   : > { %s569_s25 = scalar_lea.vmem (%p3080_p3), %s4198_s3, %s2995_s8  ;;  %s2118_s26 = sshll.u32 (%p3080_p3), %s566_s22, 2 }
  0x3b   : > { %v585_v0 = vld [vmem:[%s569_s25] sm:$0x1] (%p3080_p3)  ;;  %v587_v1 = vld [vmem:[%s569_s25 + $0x2] sm:$0x1] (%p3080_p3)  ;;  %v589_v2 = vld [vmem:[%s569_s25 + $0x4] sm:$0x1] (%p3080_p3) }
  0x3c   : > { %v591_v3 = vld [vmem:[%s569_s25 + $0x6] sm:$0x1] (%p3080_p3)  ;;  %s568_s27 = scalar_lea.vmem (%p3080_p3), [#allocation5], %s2118_s26 }
  0x3d   : > { %586 = vst [vmem:[%s568_s27] sm:$0x1] (%p3080_p3), %v585_v0  ;;  %588 = vst [vmem:[%s568_s27 + $0x1] sm:$0x1] (%p3080_p3), %v587_v1 }
  0x3e   : > { %590 = vst [vmem:[%s568_s27 + $0x2] sm:$0x1] (%p3080_p3), %v589_v2  ;;  %592 = vst [vmem:[%s568_s27 + $0x3] sm:$0x1] (%p3080_p3), %v591_v3 }
  0x40 PF: > { %p2119_p8 = scmp.ge.s32.totalorder %s2999_s9, 1  ;;  %p614_p9 = scmp.lt.s32.totalorder %s2999_s9, 3 }
  0x42   : > { %p615_p10 = pnand %p2119_p8, %p614_p9 }
  0x43   : > { %s3244_s6 = sand.u32 (!%p615_p10), 1, %s2983_s28   ;;  %vm760_vm0 = vcmask (!%p615_p10), 261120   ;;  %v3249_v4 = vld [vmem:[%s4195_s0] sm:$0xff] (!%p615_p10)  ;;  %v3001_v29 = vmov (!%p615_p10), 0   ;;  %v698_v34 = vld [vmem:[%s4197_s2 + $0x10] sm:$0xff] (!%p615_p10)  ;;  %v697_v37 = vld [vmem:[%s4197_s2 + $0x8] sm:$0xff] (!%p615_p10) }
  0x44   : > { %618 = sbr.rel (%p615_p10) target bundleno = 711 (0x2c7), region = 112  ;;  %s2120_s12 = sshll.u32 (!%p615_p10), %s3244_s6, 9  ;;  %2419 = vmatprep.mubr.msk.f32.mxu0 (!%p615_p10), %vm760_vm0, %v3249_v4  ;;  %2463 = vmatprep.mubr.msk.f32.mxu1 (!%p615_p10), %vm760_vm0, %v3249_v4  ;;  %vm3258_vm1 = vmpackc.low (!%p615_p10), %vm760_vm0, %vm760_vm0  ;;  %v696_v31 = vld [vmem:[%s4197_s2] sm:$0xff] (!%p615_p10)  ;;  %v699_v38 = vld [vmem:[%s4197_s2 + $0x18] sm:$0xff] (!%p615_p10) }
  0x45   : > { %s3262_s28 = scalar_lea.vmem (!%p615_p10), [#allocation4], %s2120_s12  ;;  %2831 = vset.pattern.permute.xlu0 (!%p615_p10), %v3001_v29  ;;  %2832 = vset.pattern.permute.xlu1 (!%p615_p10), %v3001_v29  ;;  %v700_v41 = vld [vmem:[%s4197_s2 + $0x20] sm:$0xff] (!%p615_p10)  ;;  %v701_v42 = vld [vmem:[%s4197_s2 + $0x28] sm:$0xff] (!%p615_p10)  ;;  %v702_v47 = vld [vmem:[%s4197_s2 + $0x30] sm:$0xff] (!%p615_p10)  ;;  %s687_s11 = sld [smem:[#allocation3]] (!%p615_p10) }
  0x46   : > { %v704_v6 = vld [vmem:[%s3262_s28] sm:$0xff] (!%p615_p10)  ;;  %v705_v7 = vld [vmem:[%s3262_s28 + $0x8] sm:$0xff] (!%p615_p10)  ;;  %v706_v11 = vld [vmem:[%s3262_s28 + $0x10] sm:$0xff] (!%p615_p10)  ;;  %722 = vperm.xlu0 (!%p615_p10), %2831, %v696_v31   ;;  %732 = vperm.xlu1 (!%p615_p10), %2832, %v698_v34   ;;  %s3617_s15 = sld [smem:[#allocation2]] (!%p615_p10)  ;;  %s2122_s20 = sshll.u32 (!%p615_p10), %s3244_s6, 4 }
  0x47   : > { %v2148_v8 = vld [vmem:[%s3262_s28 + $0x80] sm:$0xff] (!%p615_p10)  ;;  %v2582_v9 = vpack.c.bf16 (!%p615_p10), %v705_v7, %v704_v6  ;;  %v2149_v10 = vld [vmem:[%s3262_s28 + $0x88] sm:$0xff] (!%p615_p10)  ;;  %v707_v12 = vld [vmem:[%s3262_s28 + $0x18] sm:$0xff] (!%p615_p10)  ;;  %s671_s21 = scalar_lea.vmem (!%p615_p10), [#allocation6], %s2122_s20 }
  0x48   : > { %v2630_v13 = vpack.c.bf16 (!%p615_p10), %v2149_v10, %v2148_v8  ;;  %v2588_v14 = vpack.c.bf16 (!%p615_p10), %v707_v12, %v706_v11  ;;  %v2150_v15 = vld [vmem:[%s3262_s28 + $0x90] sm:$0xff] (!%p615_p10)  ;;  %v2151_v16 = vld [vmem:[%s3262_s28 + $0x98] sm:$0xff] (!%p615_p10)  ;;  %v708_v18 = vld [vmem:[%s3262_s28 + $0x20] sm:$0xff] (!%p615_p10) }
  0x49   : > { %2584 = vmatprep.subr.msk.bf16.mxu0 (!%p615_p10), %vm3258_vm1, %v2582_v9  ;;  %v2636_v17 = vpack.c.bf16 (!%p615_p10), %v2151_v16, %v2150_v15  ;;  %v709_v19 = vld [vmem:[%s3262_s28 + $0x28] sm:$0xff] (!%p615_p10)  ;;  %v2152_v20 = vld [vmem:[%s3262_s28 + $0xa0] sm:$0xff] (!%p615_p10)  ;;  %v710_v24 = vld [vmem:[%s3262_s28 + $0x30] sm:$0xff] (!%p615_p10) }
  0x4a   : > { %2632 = vmatprep.subr.msk.bf16.mxu1 (!%p615_p10), %vm3258_vm1, %v2630_v13  ;;  %2587 = vmatpush3.bf16.xpose.msk.msra.mxu0 (!%p615_p10), %vm3258_vm1, %v2582_v9  ;;  %v2153_v21 = vld [vmem:[%s3262_s28 + $0xa8] sm:$0xff] (!%p615_p10)  ;;  %v2594_v22 = vpack.c.bf16 (!%p615_p10), %v709_v19, %v708_v18  ;;  %v711_v25 = vld [vmem:[%s3262_s28 + $0x38] sm:$0xff] (!%p615_p10)  ;;  %v2154_v26 = vld [vmem:[%s3262_s28 + $0xb0] sm:$0xff] (!%p615_p10) }
  0x4b   : > { %2635 = vmatpush3.bf16.xpose.msk.msra.mxu1 %vm3258_vm1, %v2630_v13  ;;  %2590 = vmatprep.subr.msk.bf16.mxu0 %vm3258_vm1, %v2588_v14  ;;  %v2642_v23 = vpack.c.bf16 %v2153_v21, %v2152_v20  ;;  %v2155_v27 = vld [vmem:[%s3262_s28 + $0xb8] sm:$0xff]  ;;  %v2600_v28 = vpack.c.bf16 %v711_v25, %v710_v24  ;;  %v712_v32 = vld [vmem:[%s3262_s28 + $0x40] sm:$0xff]  ;;  %v713_v33 = vld [vmem:[%s3262_s28 + $0x48] sm:$0xff]  ;;  %s2277_s22 = sshll.u32 (%p3087_p6), %s2991_s30, 3 }
  0x4c   : > { %2638 = vmatprep.subr.msk.bf16.mxu1 %vm3258_vm1, %v2636_v17  ;;  %v2648_v30 = vpack.c.bf16 %v2155_v27, %v2154_v26  ;;  %v2156_v35 = vld [vmem:[%s3262_s28 + $0xc0] sm:$0xff]  ;;  %v2157_v36 = vld [vmem:[%s3262_s28 + $0xc8] sm:$0xff]  ;;  %v2606_v39 = vpack.c.bf16 %v713_v33, %v712_v32  ;;  %727 = vperm.xlu0 %2831, %v697_v37   ;;  %v714_v43 = vld [vmem:[%s3262_s28 + $0x50] sm:$0xff] }
  0x4d   : > { %v2654_v40 = vpack.c.bf16 %v2157_v36, %v2156_v35  ;;  %737 = vperm.xlu1 %2832, %v699_v38   ;;  %v715_v44 = vld [vmem:[%s3262_s28 + $0x58] sm:$0xff]  ;;  %v2158_v45 = vld [vmem:[%s3262_s28 + $0xd0] sm:$0xff]  ;;  %v716_v51 = vld [vmem:[%s3262_s28 + $0x60] sm:$0xff] }
  0x4e   : > { %v2159_v46 = vld [vmem:[%s3262_s28 + $0xd8] sm:$0xff]  ;;  %v2612_v49 = vpack.c.bf16 %v715_v44, %v714_v43  ;;  %v717_v52 = vld [vmem:[%s3262_s28 + $0x68] sm:$0xff]  ;;  %v2160_v53 = vld [vmem:[%s3262_s28 + $0xe0] sm:$0xff] }
  0x4f   : > { %v703_v48 = vld [vmem:[%s4197_s2 + $0x38] sm:$0xff]  ;;  %v2660_v50 = vpack.c.bf16 %v2159_v46, %v2158_v45  ;;  %v2161_v54 = vld [vmem:[%s3262_s28 + $0xe8] sm:$0xff]  ;;  %v2618_v55 = vpack.c.bf16 %v717_v52, %v716_v51  ;;  %v718_v57 = vld [vmem:[%s3262_s28 + $0x70] sm:$0xff] }
  0x50   : > { %742 = vperm.xlu0 %2831, %v700_v41   ;;  %v2666_v56 = vpack.c.bf16 %v2161_v54, %v2160_v53  ;;  %v719_v58 = vld [vmem:[%s3262_s28 + $0x78] sm:$0xff]  ;;  %v2162_v59 = vld [vmem:[%s3262_s28 + $0xf0] sm:$0xff]  ;;  %v2190_v63 = vld [vmem:[%s3262_s28 + $0x100] sm:$0xff] }
  0x51   : > { %747 = vperm.xlu1 %2832, %v701_v42   ;;  %v2163_v60 = vld [vmem:[%s3262_s28 + $0xf8] sm:$0xff]  ;;  %v2624_v61 = vpack.c.bf16 %v719_v58, %v718_v57  ;;  %v2191_v0 = vld [vmem:[%s3262_s28 + $0x108] sm:$0xff]  ;;  %v2232_v1 = vld [vmem:[%s3262_s28 + $0x180] sm:$0xff] }
  0x52   : > { %2593 = vmatpush3.bf16.xpose.msk.msra.mxu0 %vm3258_vm1, %v2588_v14  ;;  %v2672_v62 = vpack.c.bf16 %v2163_v60, %v2162_v59  ;;  %v2233_v2 = vld [vmem:[%s3262_s28 + $0x188] sm:$0xff]  ;;  %v2678_v3 = vpack.c.bf16 %v2191_v0, %v2190_v63  ;;  %v2192_v7 = vld [vmem:[%s3262_s28 + $0x110] sm:$0xff]  ;;  %v2193_v8 = vld [vmem:[%s3262_s28 + $0x118] sm:$0xff]  ;;  %v3591_v63 = vstv %s687_s11 }
  0x53   : > { %2641 = vmatpush3.bf16.xpose.msk.msra.mxu1 %vm3258_vm1, %v2636_v17  ;;  %2596 = vmatprep.subr.msk.bf16.mxu0 %vm3258_vm1, %v2594_v22  ;;  %v2726_v6 = vpack.c.bf16 %v2233_v2, %v2232_v1  ;;  %v2234_v9 = vld [vmem:[%s3262_s28 + $0x190] sm:$0xff]  ;;  %v2235_v10 = vld [vmem:[%s3262_s28 + $0x198] sm:$0xff]  ;;  %v3399_v11 = vld [vmem:[%s4195_s0 + $0x8] sm:$0xff]  ;;  %v2684_v12 = vpack.c.bf16 %v2193_v8, %v2192_v7 }
  0x54   : > { %2644 = vmatprep.subr.msk.bf16.mxu1 %vm3258_vm1, %v2642_v23  ;;  %752 = vperm.xlu0 %2831, %v702_v47   ;;  %v2732_v13 = vpack.c.bf16 %v2235_v10, %v2234_v9  ;;  %v3406_v14 = vld [vmem:[%s4195_s0 + $0x10] sm:$0xff]  ;;  %v3415_v15 = vld [vmem:[%s4195_s0 + $0x18] sm:$0xff]  ;;  %v3424_v16 = vld [vmem:[%s4195_s0 + $0x20] sm:$0xff] }
  0x55   : > { %757 = vperm.xlu1 %2832, %v703_v48   ;;  %v2194_v17 = vld [vmem:[%s3262_s28 + $0x120] sm:$0xff]  ;;  %v2195_v18 = vld [vmem:[%s3262_s28 + $0x128] sm:$0xff]  ;;  %v3454_v24 = vld [vmem:[%s4195_s0 + $0x30] sm:$0xff] }
  0x56   : > { %v2236_v19 = vld [vmem:[%s3262_s28 + $0x1a0] sm:$0xff]  ;;  %v2237_v20 = vld [vmem:[%s3262_s28 + $0x1a8] sm:$0xff]  ;;  %v3463_v25 = vld [vmem:[%s4195_s0 + $0x38] sm:$0xff] }
  0x57   : > { %v3445_v21 = vld [vmem:[%s4195_s0 + $0x28] sm:$0xff]  ;;  %v2196_v26 = vld [vmem:[%s3262_s28 + $0x130] sm:$0xff]  ;;  %v2197_v27 = vld [vmem:[%s3262_s28 + $0x138] sm:$0xff] }
  0x58   : > { %v2239_v29 = vld [vmem:[%s3262_s28 + $0x1b8] sm:$0xff]  ;;  %v2198_v32 = vld [vmem:[%s3262_s28 + $0x140] sm:$0xff]  ;;  %v2199_v33 = vld [vmem:[%s3262_s28 + $0x148] sm:$0xff] }
  0x59   : > { %v2241_v34 = vld [vmem:[%s3262_s28 + $0x1c8] sm:$0xff]  ;;  %v2702_v35 = vpack.c.bf16 %v2199_v33, %v2198_v32  ;;  %v2200_v37 = vld [vmem:[%s3262_s28 + $0x150] sm:$0xff]  ;;  %v2201_v38 = vld [vmem:[%s3262_s28 + $0x158] sm:$0xff] }
  0x5a   : > { %2599 = vmatpush3.bf16.xpose.msk.msra.mxu0 %vm3258_vm1, %v2594_v22  ;;  %v2690_v22 = vpack.c.bf16 %v2195_v18, %v2194_v17  ;;  %v2708_v41 = vpack.c.bf16 %v2201_v38, %v2200_v37  ;;  %v2202_v43 = vld [vmem:[%s3262_s28 + $0x160] sm:$0xff]  ;;  %v2203_v44 = vld [vmem:[%s3262_s28 + $0x168] sm:$0xff]  ;;  %v2246_v51 = vld [vmem:[%s3262_s28 + $0x1f0] sm:$0xff] }
  0x5b   : > { %2647 = vmatpush3.bf16.xpose.msk.msra.mxu1 %vm3258_vm1, %v2642_v23  ;;  %2602 = vmatprep.subr.msk.bf16.mxu0 %vm3258_vm1, %v2600_v28  ;;  %v2738_v23 = vpack.c.bf16 %v2237_v20, %v2236_v19  ;;  %v2244_v45 = vld [vmem:[%s3262_s28 + $0x1e0] sm:$0xff]  ;;  %v2245_v46 = vld [vmem:[%s3262_s28 + $0x1e8] sm:$0xff]  ;;  %v2714_v47 = vpack.c.bf16 %v2203_v44, %v2202_v43  ;;  %v2247_v52 = vld [vmem:[%s3262_s28 + $0x1f8] sm:$0xff] }
  0x5c   : > { %2650 = vmatprep.subr.msk.bf16.mxu1 %vm3258_vm1, %v2648_v30  ;;  %v2762_v48 = vpack.c.bf16 %v2245_v46, %v2244_v45  ;;  %v2768_v54 = vpack.c.bf16 %v2247_v52, %v2246_v51 }
  0x62   : > { %2605 = vmatpush3.bf16.xpose.msk.msra.mxu0 %vm3258_vm1, %v2600_v28  ;;  %v2238_v28 = vld [vmem:[%s3262_s28 + $0x1b0] sm:$0xff] }
  0x63   : > { %2653 = vmatpush3.bf16.xpose.msk.msra.mxu1 %vm3258_vm1, %v2648_v30  ;;  %2608 = vmatprep.subr.msk.bf16.mxu0 %vm3258_vm1, %v2606_v39  ;;  %v2696_v30 = vpack.c.bf16 %v2197_v27, %v2196_v26  ;;  %v2744_v31 = vpack.c.bf16 %v2239_v29, %v2238_v28 }
  0x64   : > { %2656 = vmatprep.subr.msk.bf16.mxu1 %vm3258_vm1, %v2654_v40 }
  0x6a   : > { %2611 = vmatpush3.bf16.xpose.msk.msra.mxu0 %vm3258_vm1, %v2606_v39  ;;  %v2242_v39 = vld [vmem:[%s3262_s28 + $0x1d0] sm:$0xff] }
  0x6b   : > { %2659 = vmatpush3.bf16.xpose.msk.msra.mxu1 %vm3258_vm1, %v2654_v40  ;;  %2614 = vmatprep.subr.msk.bf16.mxu0 %vm3258_vm1, %v2612_v49  ;;  %v2243_v40 = vld [vmem:[%s3262_s28 + $0x1d8] sm:$0xff] }
  0x6c   : > { %2662 = vmatprep.subr.msk.bf16.mxu1 %vm3258_vm1, %v2660_v50  ;;  %v2756_v42 = vpack.c.bf16 %v2243_v40, %v2242_v39 }
  0x72   : > { %2617 = vmatpush3.bf16.xpose.msk.msra.mxu0 %vm3258_vm1, %v2612_v49  ;;  %v2204_v49 = vld [vmem:[%s3262_s28 + $0x170] sm:$0xff] }
  0x73   : > { %2665 = vmatpush3.bf16.xpose.msk.msra.mxu1 %vm3258_vm1, %v2660_v50  ;;  %2620 = vmatprep.subr.msk.bf16.mxu0 %vm3258_vm1, %v2618_v55  ;;  %v2205_v50 = vld [vmem:[%s3262_s28 + $0x178] sm:$0xff] }
  0x74   : > { %2668 = vmatprep.subr.msk.bf16.mxu1 %vm3258_vm1, %v2666_v56  ;;  %v2720_v53 = vpack.c.bf16 %v2205_v50, %v2204_v49 }
  0x7a   : > { %2623 = vmatpush3.bf16.xpose.msk.msra.mxu0 %vm3258_vm1, %v2618_v55 }
  0x7b   : > { %2671 = vmatpush3.bf16.xpose.msk.msra.mxu1 %vm3258_vm1, %v2666_v56  ;;  %2626 = vmatprep.subr.msk.bf16.mxu0 %vm3258_vm1, %v2624_v61 }
  0x7c   : > { %2674 = vmatprep.subr.msk.bf16.mxu1 %vm3258_vm1, %v2672_v62 }
  0x82   : > { %2629 = vmatpush3.bf16.xpose.msk.msra.mxu0 %vm3258_vm1, %v2624_v61 }
  0x83   : > { %2677 = vmatpush3.bf16.xpose.msk.msra.mxu1 %vm3258_vm1, %v2672_v62  ;;  %2680 = vmatprep.subr.msk.bf16.mxu0 %vm3258_vm1, %v2678_v3 }
  0x84   : > { %2728 = vmatprep.subr.msk.bf16.mxu1 %vm3258_vm1, %v2726_v6 }
  0x89   : > { %2420 = vmatmul.mubr.msk.f32.vlgmr.msra.gmra.mrb[0].mxu0 %vm760_vm0, %v3399_v11 }
  0x8a   : > { %2464 = vmatmul.mubr.msk.f32.vlgmr.msra.gmra.mrb[0].mxu1 %vm760_vm0, %v3399_v11  ;;  %2683 = vmatpush3.bf16.xpose.msk.msra.mxu0 %vm3258_vm1, %v2678_v3 }
  0x8b   : > { %2731 = vmatpush3.bf16.xpose.msk.msra.mxu1 %vm3258_vm1, %v2726_v6  ;;  %2686 = vmatprep.subr.msk.bf16.mxu0 %vm3258_vm1, %v2684_v12 }
  0x8c   : > { %2734 = vmatprep.subr.msk.bf16.mxu1 %vm3258_vm1, %v2732_v13  ;;  %2422 = vmatprep.mubr.msk.f32.mxu0 %vm760_vm0, %v3406_v14 }
  0x8d   : > { %2466 = vmatprep.mubr.msk.f32.mxu1 %vm760_vm0, %v3406_v14  ;;  %2423 = vmatmul.mubr.msk.f32.gmra.mrb[2].mxu0 %vm760_vm0, %v3415_v15 }
  0x8e   : > { %2467 = vmatmul.mubr.msk.f32.gmra.mrb[2].mxu1 %vm760_vm0, %v3415_v15  ;;  %2425 = vmatprep.mubr.msk.f32.mxu0 %vm760_vm0, %v3424_v16 }
  0x8f   : > { %2469 = vmatprep.mubr.msk.f32.mxu1 %vm760_vm0, %v3424_v16 }
  0x91   : > { %2426 = vmatmul.mubr.msk.f32.gmra.mrb[4].mxu0 %vm760_vm0, %v3445_v21 }
  0x92   : > { %2689 = vmatpush3.bf16.xpose.msk.msra.mxu0 %vm3258_vm1, %v2684_v12  ;;  %2470 = vmatmul.mubr.msk.f32.gmra.mrb[4].mxu1 %vm760_vm0, %v3445_v21 }
  0x93   : > { %2737 = vmatpush3.bf16.xpose.msk.msra.mxu1 %vm3258_vm1, %v2732_v13  ;;  %2692 = vmatprep.subr.msk.bf16.mxu0 %vm3258_vm1, %v2690_v22 }
  0x94   : > { %2740 = vmatprep.subr.msk.bf16.mxu1 %vm3258_vm1, %v2738_v23  ;;  %2428 = vmatprep.mubr.msk.f32.mxu0 %vm760_vm0, %v3454_v24 }
  0x95   : > { %2472 = vmatprep.mubr.msk.f32.mxu1 %vm760_vm0, %v3454_v24  ;;  %2429 = vmatmul.mubr.msk.f32.gmra.mrb[6].mxu0 %vm760_vm0, %v3463_v25 }
  0x96   : > { %2473 = vmatmul.mubr.msk.f32.gmra.mrb[6].mxu1 %vm760_vm0, %v3463_v25  ;;  %2507 = vmatprep.mubr.msk.f32.mxu0 %vm760_vm0, %v3249_v4 }
  0x97   : > { %2551 = vmatprep.mubr.msk.f32.mxu1 %vm760_vm0, %v3249_v4  ;;  %v2240_v4 = vld [vmem:[%s3262_s28 + $0x1c0] sm:$0xff]  ;;  %s2121_s28 = sshll.u32 %s3244_s6, 2  ;;  %s1958_s6 = scalar_lea.vmem (%p3087_p6), %s4202_s7, %s2277_s22 }
  0x98   : > { %v2750_v36 = vpack.c.bf16 %v2241_v34, %v2240_v4  ;;  %s3582_s12 = scalar_lea.vmem [#allocation5], %s2121_s28 }
  0x99   : > { %v3585_v58 = vld [vmem:[%s3582_s12] ss:$0 sm:$0xff]  ;;  %v3589_v61 = vld [vmem:[%s3582_s12 + $0x1] ss:$0 sm:$0xff] }
  0x9a   : > { %2695 = vmatpush3.bf16.xpose.msk.msra.mxu0 %vm3258_vm1, %v2690_v22 }
  0x9b   : > { %2743 = vmatpush3.bf16.xpose.msk.msra.mxu1 %vm3258_vm1, %v2738_v23  ;;  %2698 = vmatprep.subr.msk.bf16.mxu0 %vm3258_vm1, %v2696_v30 }
  0x9c   : > { %2746 = vmatprep.subr.msk.bf16.mxu1 %vm3258_vm1, %v2744_v31 }
  0xa2   : > { %2701 = vmatpush3.bf16.xpose.msk.msra.mxu0 %vm3258_vm1, %v2696_v30 }
  0xa3   : > { %2749 = vmatpush3.bf16.xpose.msk.msra.mxu1 %vm3258_vm1, %v2744_v31  ;;  %2704 = vmatprep.subr.msk.bf16.mxu0 %vm3258_vm1, %v2702_v35 }
  0xa4   : > { %2752 = vmatprep.subr.msk.bf16.mxu1 %vm3258_vm1, %v2750_v36 }
  0xaa   : > { %2707 = vmatpush3.bf16.xpose.msk.msra.mxu0 %vm3258_vm1, %v2702_v35 }
  0xab   : > { %2755 = vmatpush3.bf16.xpose.msk.msra.mxu1 %vm3258_vm1, %v2750_v36  ;;  %2710 = vmatprep.subr.msk.bf16.mxu0 %vm3258_vm1, %v2708_v41 }
  0xac   : > { %2758 = vmatprep.subr.msk.bf16.mxu1 %vm3258_vm1, %v2756_v42 }
  0xb2   : > { %2713 = vmatpush3.bf16.xpose.msk.msra.mxu0 %vm3258_vm1, %v2708_v41 }
  0xb3   : > { %2761 = vmatpush3.bf16.xpose.msk.msra.mxu1 %vm3258_vm1, %v2756_v42  ;;  %2716 = vmatprep.subr.msk.bf16.mxu0 %vm3258_vm1, %v2714_v47 }
  0xb4   : > { %2764 = vmatprep.subr.msk.bf16.mxu1 %vm3258_vm1, %v2762_v48 }
  0xba   : > { %2719 = vmatpush3.bf16.xpose.msk.msra.mxu0 %vm3258_vm1, %v2714_v47 }
  0xbb   : > { %2767 = vmatpush3.bf16.xpose.msk.msra.mxu1 %vm3258_vm1, %v2762_v48  ;;  %2722 = vmatprep.subr.msk.bf16.mxu0 %vm3258_vm1, %v2720_v53  ;;  %v3654_v48 = vstv %s3617_s15 }
  0xbc   : > { %2770 = vmatprep.subr.msk.bf16.mxu1 %vm3258_vm1, %v2768_v54 }
  0xc2   : > { %2725 = vmatpush3.bf16.xpose.msk.msra.mxu0 %vm3258_vm1, %v2720_v53 }
  0xc3   : > { %2773 = vmatpush3.bf16.xpose.msk.msra.mxu1 %vm3258_vm1, %v2768_v54 }
  0xc5   : > { %v3575_v5 = vpop.permute.xlu0 %722  ;;  %v3578_v55 = vpop.permute.xlu1 %732 }
  0xc9   : > { %2508 = vmatmul.mubr.msk.f32.vlgmr.msra.gmra.mrb[8].mxu0 %vm760_vm0, %v3399_v11 }
  0xca   : > { %2552 = vmatmul.mubr.msk.f32.vlgmr.msra.gmra.mrb[8].mxu1 %vm760_vm0, %v3399_v11  ;;  %2510 = vmatprep.mubr.msk.f32.mxu0 %vm760_vm0, %v3406_v14 }
  0xcb   : > { %2554 = vmatprep.mubr.msk.f32.mxu1 %vm760_vm0, %v3406_v14  ;;  %v3580_v56 = vpop.permute.xlu0 %727 }
  0xcc   : > { %v3595_v3 = vpop.permute.xlu1 %737 }
  0xcd   : > { %2511 = vmatmul.mubr.msk.f32.gmra.mrb[10].mxu0 %vm760_vm0, %v3415_v15 }
  0xce   : > { %2555 = vmatmul.mubr.msk.f32.gmra.mrb[10].mxu1 %vm760_vm0, %v3415_v15  ;;  %2513 = vmatprep.mubr.msk.f32.mxu0 %vm760_vm0, %v3424_v16 }
  0xcf   : > { %2557 = vmatprep.mubr.msk.f32.mxu1 %vm760_vm0, %v3424_v16 }
  0xd0   : > { %v3620_v23 = vpop.permute.xlu1 %747 }
  0xd1   : > { %2514 = vmatmul.mubr.msk.f32.gmra.mrb[12].mxu0 %vm760_vm0, %v3445_v21 }
  0xd2   : > { %2558 = vmatmul.mubr.msk.f32.gmra.mrb[12].mxu1 %vm760_vm0, %v3445_v21  ;;  %2516 = vmatprep.mubr.msk.f32.mxu0 %vm760_vm0, %v3454_v24  ;;  %v3615_v21 = vpop.permute.xlu0 %742 }
  0xd3   : > { %2560 = vmatprep.mubr.msk.f32.mxu1 %vm760_vm0, %v3454_v24 }
  0xd5   : > { %2517 = vmatmul.mubr.msk.f32.gmra.mrb[14].mxu0 %vm760_vm0, %v3463_v25 }
  0xd6   : > { %2561 = vmatmul.mubr.msk.f32.gmra.mrb[14].mxu1 %vm760_vm0, %v3463_v25  ;;  %v3651_v47 = vpop.permute.xlu0 %752 }
 0x15c   : > { %v2421_v57 = vpop.f32.mrb[0].mxu0 }
 0x15d   : > { %v905_v59 = vadd.f32 %v2421_v57, %v3580_v56  ;;  %v2465_v60 = vpop.f32.mrb[0].mxu1  ;;  %v899_v62 = vpop.f32.mrb[1].mxu0 }
 0x15e   : > { %v1172_v0 = vadd.f32 %v2465_v60, %v3580_v56  ;;  %v900_v1 = vadd.f32 %v899_v62, %v3575_v5  ;;  %v1166_v2 = vpop.f32.mrb[1].mxu1 }
 0x15f   : > { %v946_v6 = vadd.f32 %v3585_v58, %v905_v59  ;;  %v1167_v7 = vadd.f32 %v1166_v2, %v3575_v5  ;;  %v3682_v2 = vpop.permute.xlu1 %757 }
 0x160   : > { %v1214_v8 = vadd.f32 %v3589_v61, %v1172_v0  ;;  %v945_v9 = vadd.f32 %v3585_v58, %v900_v1  ;;  %v2424_v10 = vpop.f32.mrb[2].mxu0 }
 0x161   : > { %v3602_v11 = vmax.f32 %v946_v6, %v3591_v63  ;;  %v1213_v12 = vadd.f32 %v3589_v61, %v1167_v7  ;;  %v2468_v13 = vpop.f32.mrb[2].mxu1  ;;  %v915_v14 = vadd.f32 %v2424_v10, %v3595_v3  ;;  %v909_v15 = vpop.f32.mrb[3].mxu0 }
 0x162   : > { %v3607_v16 = vmax.f32 %v1214_v8, %v3591_v63  ;;  %v3610_v17 = vmax.f32 %v945_v9, %v3591_v63  ;;  %v1182_v18 = vadd.f32 %v2468_v13, %v3595_v3  ;;  %v910_v19 = vadd.f32 %v909_v15, %v3578_v55  ;;  %v1176_v20 = vpop.f32.mrb[3].mxu1 }
 0x163   : > { %2833 = vrsqrt.f32 %v3602_v11  ;;  %v3624_v26 = vmax.f32 %v1213_v12, %v3591_v63  ;;  %v948_v27 = vadd.f32 %v3585_v58, %v915_v14  ;;  %v1177_v31 = vadd.f32 %v1176_v20, %v3578_v55 }
 0x164   : > { %2835 = vrsqrt.f32 %v3607_v16  ;;  %v2427_v22 = vpop.f32.mrb[4].mxu0  ;;  %v1216_v28 = vadd.f32 %v3589_v61, %v1182_v18  ;;  %v947_v29 = vadd.f32 %v3585_v58, %v910_v19  ;;  %vm971_vm2 = vcmp.eq.f32.partialorder %v3602_v11, inf }
 0x165   : > { %2837 = vrsqrt.f32 %v3610_v17  ;;  %v2471_v24 = vpop.f32.mrb[4].mxu1  ;;  %v919_v25 = vpop.f32.mrb[5].mxu0  ;;  %v925_v32 = vadd.f32 %v2427_v22, %v3620_v23  ;;  %v3635_v35 = vmax.f32 %v948_v27, %v3591_v63  ;;  %v1215_v38 = vadd.f32 %v3589_v61, %v1177_v31 }
 0x166   : > { %v1186_v30 = vpop.f32.mrb[5].mxu1  ;;  %v1192_v33 = vadd.f32 %v2471_v24, %v3620_v23  ;;  %v920_v4 = vadd.f32 %v919_v25, %v3615_v21  ;;  %2839 = vrsqrt.f32 %v3624_v26  ;;  %v3638_v36 = vmax.f32 %v1216_v28, %v3591_v63 }
 0x167   : > { %v3641_v37 = vmax.f32 %v947_v29, %v3591_v63  ;;  %v950_v41 = vadd.f32 %v3585_v58, %v925_v32  ;;  %v1187_v44 = vadd.f32 %v1186_v30, %v3615_v21  ;;  %v974_v46 = vand.u32 2147483648, %v3602_v11 }
 0x168   : > { %v2430_v34 = vpop.f32.mrb[6].mxu0  ;;  %v1218_v42 = vadd.f32 %v3589_v61, %v1192_v33  ;;  %v949_v43 = vadd.f32 %v3585_v58, %v920_v4  ;;  %2841 = vrsqrt.f32 %v3635_v35  ;;  %vm1238_vm3 = vcmp.eq.f32.partialorder %v3607_v16, inf }
 0x169   : > { %v2474_v39 = vpop.f32.mrb[6].mxu1  ;;  %v929_v40 = vpop.f32.mrb[7].mxu0  ;;  %2843 = vrsqrt.f32 %v3638_v36  ;;  %v3659_v49 = vmax.f32 %v1215_v38, %v3591_v63  ;;  %v3662_v50 = vmax.f32 %v950_v41, %v3591_v63  ;;  %vm973_vm4 = vcmp.eq.f32.partialorder %v3602_v11, 0.0 }
 0x16a   : > { %v1196_v45 = vpop.f32.mrb[7].mxu1  ;;  %v3665_v51 = vmax.f32 %v1218_v42, %v3591_v63  ;;  %v1241_v53 = vand.u32 2147483648, %v3607_v16  ;;  %2845 = vrsqrt.f32 %v3641_v37  ;;  %v3671_v54 = vmax.f32 %v949_v43, %v3591_v63 }
 0x16b   : > { %v1217_v57 = vadd.f32 %v3589_v61, %v1187_v44  ;;  %vm964_vm5 = vcmp.eq.f32.partialorder %v3610_v17, inf  ;;  %vm966_vm6 = vcmp.eq.f32.partialorder %v3610_v17, 0.0  ;;  %2847 = vrsqrt.f32 %v3659_v49 }
 0x16c   : > { %v930_v60 = vadd.f32 %v929_v40, %v3651_v47  ;;  %v967_v1 = vand.u32 2147483648, %v3610_v17  ;;  %vm1231_vm7 = vcmp.eq.f32.partialorder %v3624_v26, inf  ;;  %2849 = vrsqrt.f32 %v3662_v50 }
 0x16d   : > { %v2834_v52 = vpop.eup %2833  ;;  %v1234_v7 = vand.u32 2147483648, %v3624_v26  ;;  %vm978_vm8 = vcmp.eq.f32.partialorder %v3641_v37, inf  ;;  %2851 = vrsqrt.f32 %v3665_v51  ;;  %v981_v9 = vand.u32 2147483648, %v3641_v37 }
 0x16e   : > { %v2836_v59 = vpop.eup %2835  ;;  %v970_v0 = vmul.f32 %v2834_v52, %v3602_v11  ;;  %2853 = vrsqrt.f32 %v3671_v54  ;;  %v3692_v10 = vmax.f32 %v1217_v57, %v3591_v63  ;;  %v951_v14 = vadd.f32 %v3585_v58, %v930_v60 }
 0x16f   : > { %v2838_v62 = vpop.eup %2837  ;;  %v1237_v8 = vmul.f32 %v2836_v59, %v3607_v16  ;;  %v1197_v15 = vadd.f32 %v1196_v45, %v3651_v47  ;;  %v935_v18 = vadd.f32 %v2430_v34, %v3682_v2  ;;  %vm1233_vm9 = vcmp.eq.f32.partialorder %v3624_v26, 0.0 }
 0x170   : > { %v963_v6 = vmul.f32 %v2838_v62, %v3610_v17  ;;  %v2840_v12 = vpop.eup %2839  ;;  %v972_v19 = vsel %vm971_vm2, %v3602_v11, %v970_v0  ;;  %vm980_vm10 = vcmp.eq.f32.partialorder %v3641_v37, 0.0  ;;  %vm1245_vm11 = vcmp.eq.f32.partialorder %v3659_v49, inf }
 0x171   : > { %v1230_v20 = vmul.f32 %v2840_v12, %v3624_v26  ;;  %2855 = vrsqrt.f32 %v3692_v10  ;;  %vm1240_vm12 = vcmp.eq.f32.partialorder %v3607_v16, 0.0  ;;  %v1248_v22 = vand.u32 2147483648, %v3659_v49 }
 0x172   : > { %v965_v13 = vsel %vm964_vm5, %v3610_v17, %v963_v6  ;;  %v3711_v24 = vmax.f32 %v951_v14, %v3591_v63  ;;  %v1219_v25 = vadd.f32 %v3589_v61, %v1197_v15  ;;  %v952_v27 = vadd.f32 %v3585_v58, %v935_v18  ;;  %v2842_v28 = vpop.eup %2841 }
 0x173   : > { %v1239_v29 = vsel %vm1238_vm3, %v3607_v16, %v1237_v8  ;;  %vm992_vm13 = vcmp.eq.f32.partialorder %v3671_v54, inf  ;;  %v1202_v30 = vadd.f32 %v2474_v39, %v3682_v2  ;;  %v968_v31 = vsel %vm966_vm6, %v967_v1, %v965_v13  ;;  %v2844_v32 = vpop.eup %2843 }
 0x174   : > { %vm1247_vm14 = vcmp.eq.f32.partialorder %v3659_v49, 0.0  ;;  %v995_v33 = vand.u32 2147483648, %v3671_v54  ;;  %vm1259_vm15 = vcmp.eq.f32.partialorder %v3692_v10, inf  ;;  %2857 = vrsqrt.f32 %v3711_v24  ;;  %v2846_v4 = vpop.eup %2845 }
 0x175   : > { %v975_v58 = vsel %vm973_vm4, %v974_v46, %v972_v19  ;;  %v1232_v34 = vsel %vm1231_vm7, %v3624_v26, %v1230_v20  ;;  %v1262_v17 = vand.u32 2147483648, %v3692_v10  ;;  %v3733_v38 = vmax.f32 %v1219_v25, %v3591_v63  ;;  %v2848_v40 = vpop.eup %2847 }
 0x176   : > { %v3736_v39 = vmax.f32 %v952_v27, %v3591_v63  ;;  %v984_v41 = vmul.f32 %v2842_v28, %v3635_v35  ;;  %v977_v42 = vmul.f32 %v2846_v4, %v3641_v37  ;;  %v1220_v11 = vadd.f32 %v3589_v61, %v1202_v30  ;;  %v2850_v44 = vpop.eup %2849 }
 0x177   : > { %v1019_v43 = vsub.f32 %v3654_v48, %v968_v31  ;;  %v1244_v45 = vmul.f32 %v2848_v40, %v3659_v49  ;;  %vm994_vm0 = vcmp.eq.f32.partialorder %v3671_v54, 0.0  ;;  %vm1006_vm1 = vcmp.eq.f32.partialorder %v3711_v24, inf  ;;  %v2852_v52 = vpop.eup %2851 }
 0x178   : > { %2859 = vrsqrt.f32 %v3733_v38  ;;  %v1020_v46 = vsub.f32 %v3654_v48, %v975_v58  ;;  %v1251_v57 = vmul.f32 %v2844_v32, %v3638_v36  ;;  %v979_v61 = vsel %vm978_vm8, %v3641_v37, %v977_v42  ;;  %v2854_v60 = vpop.eup %2853 }
 0x179   : > { %v1009_v59 = vand.u32 2147483648, %v3711_v24  ;;  %2861 = vrsqrt.f32 %v3736_v39  ;;  %v1246_v62 = vsel %vm1245_vm11, %v3659_v49, %v1244_v45  ;;  %v998_v0 = vmul.f32 %v2850_v44, %v3662_v50 }
 0x17a   : > { %v3758_v1 = vmul.f32 %v2852_v52, %v3665_v51  ;;  %vm1273_vm2 = vcmp.eq.f32.partialorder %v3733_v38, inf  ;;  %v1276_v6 = vand.u32 2147483648, %v3733_v38  ;;  %v991_v8 = vmul.f32 %v2854_v60, %v3671_v54 }
 0x17b   : > { %vm1261_vm3 = vcmp.eq.f32.partialorder %v3692_v10, 0.0  ;;  %v3765_v12 = vmax.f32 %v1220_v11, %v3591_v63  ;;  %2863 = vtanh.f32 %v1019_v43  ;;  %v1235_v13 = vsel %vm1233_vm9, %v1234_v7, %v1232_v34  ;;  %v2856_v14 = vpop.eup %2855 }
 0x17c   : > { %v1016_v15 = vand.u32 2147483648, %v3736_v39  ;;  %2865 = vtanh.f32 %v1020_v46  ;;  %v1242_v18 = vsel %vm1240_vm12, %v1241_v53, %v1239_v29  ;;  %v1285_v19 = vsub.f32 %v3654_v48, %v1235_v13 }
 0x17d   : > { %v993_v20 = vsel %vm992_vm13, %v3671_v54, %v991_v8  ;;  %v1258_v25 = vmul.f32 %v2856_v14, %v3692_v10  ;;  %2867 = vrsqrt.f32 %v3765_v12  ;;  %v982_v26 = vsel %vm980_vm10, %v981_v9, %v979_v61 }
 0x17e   : > { %v1283_v7 = vand.u32 2147483648, %v3765_v12  ;;  %v1286_v16 = vsub.f32 %v3654_v48, %v1242_v18  ;;  %2869 = vtanh.f32 %v1285_v19  ;;  %vm985_vm4 = vcmp.eq.f32.partialorder %v3635_v35, inf  ;;  %v2858_v53 = vpop.eup %2857 }
 0x17f   : > { %v1260_v27 = vsel %vm1259_vm15, %v3692_v10, %v1258_v25  ;;  %vm1008_vm5 = vcmp.eq.f32.partialorder %v3711_v24, 0.0  ;;  %vm1013_vm6 = vcmp.eq.f32.partialorder %v3736_v39, inf  ;;  %v986_v28 = vsel %vm985_vm4, %v3635_v35, %v984_v41 }
 0x180   : > { %vm987_vm7 = vcmp.eq.f32.partialorder %v3635_v35, 0.0  ;;  %v988_v37 = vand.u32 2147483648, %v3635_v35  ;;  %v1005_v9 = vmul.f32 %v2858_v53, %v3711_v24  ;;  %2871 = vtanh.f32 %v1286_v16 }
 0x181   : > { %v1021_v29 = vsub.f32 %v3654_v48, %v982_v26  ;;  %v1249_v30 = vsel %vm1247_vm14, %v1248_v22, %v1246_v62  ;;  %vm1275_vm8 = vcmp.eq.f32.partialorder %v3733_v38, 0.0  ;;  %vm1280_vm9 = vcmp.eq.f32.partialorder %v3765_v12, inf  ;;  %v1857_v26 = vld [vmem:[%s4199_s4] sm:$0xff] }
 0x182   : > { %v989_v31 = vsel %vm987_vm7, %v988_v37, %v986_v28  ;;  %vm1252_vm10 = vcmp.eq.f32.partialorder %v3638_v36, inf  ;;  %vm1254_vm11 = vcmp.eq.f32.partialorder %v3638_v36, 0.0  ;;  %v1255_v35 = vand.u32 2147483648, %v3638_v36  ;;  %v2860_v32 = vpop.eup %2859 }
 0x183   : > { %v1007_v58 = vsel %vm1006_vm1, %v3711_v24, %v1005_v9  ;;  %v1022_v4 = vsub.f32 %v3654_v48, %v989_v31  ;;  %2873 = vtanh.f32 %v1021_v29  ;;  %v1253_v49 = vsel %vm1252_vm10, %v3638_v36, %v1251_v57  ;;  %v2862_v22 = vpop.eup %2861 }
 0x184   : > { %v1272_v34 = vmul.f32 %v2860_v32, %v3733_v38  ;;  %v1256_v40 = vsel %vm1254_vm11, %v1255_v35, %v1253_v49  ;;  %v1287_v41 = vsub.f32 %v3654_v48, %v1249_v30  ;;  %v996_v42 = vsel %vm994_vm0, %v995_v33, %v993_v20 }
 0x185   : > { %v1012_v11 = vmul.f32 %v2862_v22, %v3736_v39  ;;  %2875 = vtanh.f32 %v1022_v4  ;;  %v1288_v43 = vsub.f32 %v3654_v48, %v1256_v40  ;;  %vm999_vm12 = vcmp.eq.f32.partialorder %v3662_v50, inf  ;;  %v2864_v44 = vpop.eup %2863  ;;  %v3885_v40 = vld [vmem:[%s3582_s12 + $0x2] ss:$0 sm:$0xff] }
 0x186   : > { %v1274_v36 = vsel %vm1273_vm2, %v3733_v38, %v1272_v34  ;;  %2877 = vtanh.f32 %v1287_v41  ;;  %v1000_v45 = vsel %vm999_vm12, %v3662_v50, %v998_v0  ;;  %vm1001_vm13 = vcmp.eq.f32.partialorder %v3662_v50, 0.0  ;;  %v2866_v46 = vpop.eup %2865 }
 0x187   : > { %2879 = vtanh.f32 %v1288_v43  ;;  %v1002_v54 = vand.u32 2147483648, %v3662_v50  ;;  %v1023_v33 = vsub.f32 %v3654_v48, %v996_v42  ;;  %v1263_v52 = vsel %vm1261_vm3, %v1262_v17, %v1260_v27  ;;  %v2868_v57 = vpop.eup %2867 }
 0x188   : > { %vm1266_vm14 = vcmp.eq.f32.partialorder %v3665_v51, inf  ;;  %vm1268_vm15 = vcmp.eq.f32.partialorder %v3665_v51, 0.0  ;;  %v1269_v61 = vand.u32 2147483648, %v3665_v51  ;;  %v1289_v60 = vsub.f32 %v3654_v48, %v1263_v52  ;;  %v2870_v62 = vpop.eup %2869 }
 0x189   : > { %v1279_v0 = vmul.f32 %v2868_v57, %v3765_v12  ;;  %v1003_v50 = vsel %vm1001_vm13, %v1002_v54, %v1000_v45  ;;  %2881 = vtanh.f32 %v1023_v33  ;;  %v1267_v8 = vsel %vm1266_vm14, %v3665_v51, %v3758_v1 }
 0x18a   : > { %v3840_v13 = vadd.f32 %v2870_v62, %v2864_v44  ;;  %v1024_v10 = vsub.f32 %v3654_v48, %v1003_v50  ;;  %v1270_v17 = vsel %vm1268_vm15, %v1269_v61, %v1267_v8  ;;  %2883 = vtanh.f32 %v1289_v60  ;;  %v2872_v14 = vpop.eup %2871 }
 0x18b   : > { %v1290_v18 = vsub.f32 %v3654_v48, %v1270_v17  ;;  %v1010_v19 = vsel %vm1008_vm5, %v1009_v59, %v1007_v58  ;;  %v1014_v20 = vsel %vm1013_vm6, %v3736_v39, %v1012_v11  ;;  %vm1015_vm0 = vcmp.eq.f32.partialorder %v3736_v39, 0.0  ;;  %v3889_v11 = vld [vmem:[%s3582_s12 + $0x3] ss:$0 sm:$0xff] }
 0x18c   : > { %v3852_v51 = vadd.f32 %v2872_v14, %v2866_v46  ;;  %2885 = vtanh.f32 %v1024_v10  ;;  %v1017_v1 = vsel %vm1015_vm0, %v1016_v15, %v1014_v20  ;;  %v1025_v25 = vsub.f32 %v3654_v48, %v1010_v19 }
 0x18d   : > { %v2874_v24 = vpop.eup %2873  ;;  %2887 = vtanh.f32 %v1290_v18  ;;  %v1026_v59 = vsub.f32 %v3654_v48, %v1017_v1  ;;  %v1277_v16 = vsel %vm1275_vm8, %v1276_v6, %v1274_v36  ;;  %v1281_v39 = vsel %vm1280_vm9, %v3765_v12, %v1279_v0 }
 0x18e   : > { %2889 = vtanh.f32 %v1025_v25  ;;  %vm1282_vm1 = vcmp.eq.f32.partialorder %v3765_v12, 0.0  ;;  %v1291_v15 = vsub.f32 %v3654_v48, %v1277_v16  ;;  %vm1859_vm2 = vcmask 523264  }
 0x18f   : > { %v2876_v53 = vpop.eup %2875  ;;  %2891 = vtanh.f32 %v1026_v59  ;;  %v1284_v27 = vsel %vm1282_vm1, %v1283_v7, %v1281_v39  ;;  %2579 = vmatprep.mubr.msk.f32.mxu0 %vm1859_vm2, %v1857_v26 }
 0x190   : > { %v2878_v28 = vpop.eup %2877  ;;  %v1292_v38 = vsub.f32 %v3654_v48, %v1284_v27  ;;  %2893 = vtanh.f32 %v1291_v15 }
 0x191   : > { %v2880_v6 = vpop.eup %2879  ;;  %v3874_v37 = vadd.f32 %v2878_v28, %v2874_v24 }
 0x192   : > { %v3876_v9 = vadd.f32 %v2880_v6, %v2876_v53  ;;  %2895 = vtanh.f32 %v1292_v38 }
 0x193   : > { %v2882_v29 = vpop.eup %2881 }
 0x194   : > { %v2884_v30 = vpop.eup %2883 }
 0x195   : > { %v3878_v31 = vadd.f32 %v2884_v30, %v2882_v29 }
 0x196   : > { %v2886_v12 = vpop.eup %2885 }
 0x197   : > { %v2888_v7 = vpop.eup %2887 }
 0x198   : > { %v2890_v35 = vpop.eup %2889  ;;  %v3880_v32 = vadd.f32 %v2888_v7, %v2886_v12 }
 0x199   : > { %v2892_v58 = vpop.eup %2891 }
 0x19a   : > { %v2894_v4 = vpop.eup %2893 }
 0x19b   : > { %v3882_v49 = vadd.f32 %v2894_v4, %v2890_v35 }
 0x19c   : > { %v2896_v22 = vpop.eup %2895  ;;  %v2509_v34 = vpop.f32.mrb[8].mxu0 }
 0x19d   : > { %v1446_v41 = vadd.f32 %v2509_v34, %v3580_v56  ;;  %v2553_v42 = vpop.f32.mrb[8].mxu1  ;;  %v1440_v43 = vpop.f32.mrb[9].mxu0  ;;  %v3891_v44 = vadd.f32 %v2896_v22, %v2892_v58 }
 0x19e   : > { %v1720_v36 = vadd.f32 %v2553_v42, %v3580_v56  ;;  %v1441_v45 = vadd.f32 %v1440_v43, %v3575_v5  ;;  %v1714_v46 = vpop.f32.mrb[9].mxu1 }
 0x19f   : > { %v1488_v54 = vadd.f32 %v3885_v40, %v1446_v41  ;;  %v1715_v33 = vadd.f32 %v1714_v46, %v3575_v5 }
 0x1a0   : > { %v1762_v52 = vadd.f32 %v3889_v11, %v1720_v36  ;;  %v1487_v57 = vadd.f32 %v3885_v40, %v1441_v45  ;;  %v2512_v61 = vpop.f32.mrb[10].mxu0 }
 0x1a1   : > { %v3900_v60 = vmax.f32 %v1488_v54, %v3591_v63  ;;  %v1761_v62 = vadd.f32 %v3889_v11, %v1715_v33  ;;  %v1456_v0 = vadd.f32 %v2512_v61, %v3595_v3  ;;  %v2556_v56 = vpop.f32.mrb[10].mxu1  ;;  %v1450_v50 = vpop.f32.mrb[11].mxu0 }
 0x1a2   : > { %v3905_v8 = vmax.f32 %v1762_v52, %v3591_v63  ;;  %v3908_v10 = vmax.f32 %v1487_v57, %v3591_v63  ;;  %v1730_v5 = vadd.f32 %v2556_v56, %v3595_v3  ;;  %v1451_v17 = vadd.f32 %v1450_v50, %v3578_v55  ;;  %v1724_v14 = vpop.f32.mrb[11].mxu1 }
 0x1a3   : > { %2897 = vrsqrt.f32 %v3900_v60  ;;  %v3916_v19 = vmax.f32 %v1761_v62, %v3591_v63  ;;  %v1490_v25 = vadd.f32 %v3885_v40, %v1456_v0  ;;  %v1725_v24 = vadd.f32 %v1724_v14, %v3578_v55 }
 0x1a4   : > { %2899 = vrsqrt.f32 %v3905_v8  ;;  %v2515_v18 = vpop.f32.mrb[12].mxu0  ;;  %v1764_v26 = vadd.f32 %v3889_v11, %v1730_v5  ;;  %v1489_v3 = vadd.f32 %v3885_v40, %v1451_v17  ;;  %vm1512_vm3 = vcmp.eq.f32.partialorder %v3900_v60, inf }
 0x1a5   : > { %2901 = vrsqrt.f32 %v3908_v10  ;;  %v2559_v20 = vpop.f32.mrb[12].mxu1  ;;  %v1460_v1 = vpop.f32.mrb[13].mxu0  ;;  %v1466_v16 = vadd.f32 %v2515_v18, %v3620_v23  ;;  %v3925_v39 = vmax.f32 %v1490_v25, %v3591_v63  ;;  %v1763_v27 = vadd.f32 %v3889_v11, %v1725_v24 }
 0x1a6   : > { %v1734_v59 = vpop.f32.mrb[13].mxu1  ;;  %2903 = vrsqrt.f32 %v3916_v19  ;;  %v3928_v15 = vmax.f32 %v1764_v26, %v3591_v63  ;;  %v3931_v53 = vmax.f32 %v1489_v3, %v3591_v63  ;;  %v1740_v55 = vadd.f32 %v2559_v20, %v3620_v23 }
 0x1a7   : > { %v1492_v38 = vadd.f32 %v3885_v40, %v1466_v16  ;;  %v1461_v6 = vadd.f32 %v1460_v1, %v3615_v21  ;;  %v1735_v29 = vadd.f32 %v1734_v59, %v3615_v21  ;;  %2905 = vrsqrt.f32 %v3925_v39 }
 0x1a8   : > { %v2518_v28 = vpop.f32.mrb[14].mxu0  ;;  %2907 = vrsqrt.f32 %v3928_v15  ;;  %v3942_v35 = vmax.f32 %v1763_v27, %v3591_v63  ;;  %v1766_v23 = vadd.f32 %v3889_v11, %v1740_v55  ;;  %v1515_v41 = vand.u32 2147483648, %v3900_v60 }
 0x1a9   : > { %v2562_v30 = vpop.f32.mrb[14].mxu1  ;;  %v1470_v12 = vpop.f32.mrb[15].mxu0  ;;  %2909 = vrsqrt.f32 %v3931_v53  ;;  %v3945_v4 = vmax.f32 %v1492_v38, %v3591_v63  ;;  %v1491_v21 = vadd.f32 %v3885_v40, %v1461_v6  ;;  %v1765_v22 = vadd.f32 %v3889_v11, %v1735_v29 }
 0x1aa   : > { %v1744_v7 = vpop.f32.mrb[15].mxu1  ;;  %v1789_v42 = vand.u32 2147483648, %v3905_v8  ;;  %2911 = vrsqrt.f32 %v3942_v35  ;;  %vm1514_vm4 = vcmp.eq.f32.partialorder %v3900_v60, 0.0  ;;  %vm1505_vm5 = vcmp.eq.f32.partialorder %v3908_v10, inf }
 0x1ab   : > { %vm1507_vm6 = vcmp.eq.f32.partialorder %v3908_v10, 0.0  ;;  %v1508_v36 = vand.u32 2147483648, %v3908_v10  ;;  %2913 = vrsqrt.f32 %v3945_v4  ;;  %v1782_v54 = vand.u32 2147483648, %v3916_v19 }
 0x1ac   : > { %v3963_v33 = vmax.f32 %v1766_v23, %v3591_v63  ;;  %vm1526_vm7 = vcmp.eq.f32.partialorder %v3925_v39, inf  ;;  %v3967_v57 = vmax.f32 %v1491_v21, %v3591_v63  ;;  %v3970_v61 = vmax.f32 %v1765_v22, %v3591_v63 }
 0x1ad   : > { %v2898_v58 = vpop.eup %2897  ;;  %v1476_v62 = vadd.f32 %v2518_v28, %v3682_v2  ;;  %v1750_v0 = vadd.f32 %v2562_v30, %v3682_v2  ;;  %v1529_v56 = vand.u32 2147483648, %v3925_v39  ;;  %v1803_v50 = vand.u32 2147483648, %v3928_v15 }
 0x1ae   : > { %v2900_v34 = vpop.eup %2899  ;;  %v1511_v45 = vmul.f32 %v2898_v58, %v3900_v60  ;;  %vm1519_vm8 = vcmp.eq.f32.partialorder %v3931_v53, inf  ;;  %2915 = vrsqrt.f32 %v3963_v33  ;;  %vm1779_vm9 = vcmp.eq.f32.partialorder %v3916_v19, inf }
 0x1af   : > { %v2902_v43 = vpop.eup %2901  ;;  %v1522_v17 = vand.u32 2147483648, %v3931_v53  ;;  %v1796_v14 = vand.u32 2147483648, %v3942_v35  ;;  %2917 = vrsqrt.f32 %v3967_v57  ;;  %v3989_v20 = vmul.f32 %v2900_v34, %v3905_v8 }
 0x1b0   : > { %v1504_v46 = vmul.f32 %v2902_v43, %v3908_v10  ;;  %v2904_v52 = vpop.eup %2903  ;;  %v1513_v18 = vsel %vm1512_vm3, %v3900_v60, %v1511_v45  ;;  %vm1540_vm10 = vcmp.eq.f32.partialorder %v3945_v4, inf  ;;  %2919 = vrsqrt.f32 %v3970_v61 }
 0x1b1   : > { %v2906_v2 = vpop.eup %2905  ;;  %v1543_v25 = vand.u32 2147483648, %v3945_v4  ;;  %v1494_v26 = vadd.f32 %v3885_v40, %v1476_v62  ;;  %v1768_v3 = vadd.f32 %v3889_v11, %v1750_v0  ;;  %v1471_v24 = vadd.f32 %v1470_v12, %v3651_v47 }
 0x1b2   : > { %v1506_v5 = vsel %vm1505_vm5, %v3908_v10, %v1504_v46  ;;  %v2908_v1 = vpop.eup %2907  ;;  %v1778_v16 = vmul.f32 %v2904_v52, %v3916_v19  ;;  %v1525_v27 = vmul.f32 %v2906_v2, %v3925_v39  ;;  %v1745_v28 = vadd.f32 %v1744_v7, %v3651_v47 }
 0x1b3   : > { %v2910_v59 = vpop.eup %2909  ;;  %v1509_v38 = vsel %vm1507_vm6, %v1508_v36, %v1506_v5  ;;  %vm1786_vm11 = vcmp.eq.f32.partialorder %v3905_v8, inf  ;;  %v1817_v6 = vand.u32 2147483648, %v3963_v33  ;;  %v4006_v29 = vmax.f32 %v1494_v26, %v3591_v63 }
 0x1b4   : > { %v1518_v55 = vmul.f32 %v2910_v59, %v3931_v53  ;;  %v4009_v30 = vmax.f32 %v1768_v3, %v3591_v63  ;;  %v2912_v12 = vpop.eup %2911  ;;  %vm1528_vm12 = vcmp.eq.f32.partialorder %v3925_v39, 0.0  ;;  %vm1521_vm13 = vcmp.eq.f32.partialorder %v3931_v53, 0.0 }
 0x1b5   : > { %vm1793_vm14 = vcmp.eq.f32.partialorder %v3942_v35, inf  ;;  %v1493_v47 = vadd.f32 %v3885_v40, %v1471_v24  ;;  %v1767_v10 = vadd.f32 %v3889_v11, %v1745_v28  ;;  %v1516_v7 = vsel %vm1514_vm4, %v1515_v41, %v1513_v18  ;;  %v2914_v23 = vpop.eup %2913 }
 0x1b6   : > { %v1559_v58 = vsub.f32 %v3654_v48, %v1509_v38  ;;  %vm1533_vm15 = vcmp.eq.f32.partialorder %v3967_v57, inf  ;;  %v1536_v21 = vand.u32 2147483648, %v3967_v57  ;;  %v1810_v22 = vand.u32 2147483648, %v3970_v61 }
 0x1b7   : > { %2921 = vrsqrt.f32 %v4006_v29  ;;  %v1527_v40 = vsel %vm1526_vm7, %v3925_v39, %v1525_v27  ;;  %v1799_v11 = vmul.f32 %v2908_v1, %v3928_v15  ;;  %vm1800_vm0 = vcmp.eq.f32.partialorder %v3928_v15, inf }
 0x1b8   : > { %v1539_v60 = vmul.f32 %v2914_v23, %v3945_v4  ;;  %vm1535_vm1 = vcmp.eq.f32.partialorder %v3967_v57, 0.0  ;;  %2923 = vrsqrt.f32 %v4009_v30  ;;  %v1520_v34 = vsel %vm1519_vm8, %v3931_v53, %v1518_v55  ;;  %v2916_v45 = vpop.eup %2915 }
 0x1b9   : > { %v4035_v41 = vmax.f32 %v1493_v47, %v3591_v63  ;;  %v4038_v43 = vmax.f32 %v1767_v10, %v3591_v63  ;;  %v1560_v36 = vsub.f32 %v3654_v48, %v1516_v7  ;;  %v1792_v46 = vmul.f32 %v2912_v12, %v3942_v35  ;;  %v2918_v0 = vpop.eup %2917 }
 0x1ba   : > { %v1557_v52 = vand.u32 2147483648, %v4006_v29  ;;  %2925 = vtanh.f32 %v1559_v58  ;;  %v1780_v62 = vsel %vm1779_vm9, %v3916_v19, %v1778_v16  ;;  %v1541_v5 = vsel %vm1540_vm10, %v3945_v4, %v1539_v60  ;;  %v2920_v2 = vpop.eup %2919 }
 0x1bb   : > { %vm1542_vm3 = vcmp.eq.f32.partialorder %v3945_v4, 0.0  ;;  %vm1554_vm4 = vcmp.eq.f32.partialorder %v4006_v29, inf  ;;  %v1831_v63 = vand.u32 2147483648, %v4009_v30  ;;  %2927 = vrsqrt.f32 %v4035_v41 }
 0x1bc   : > { %vm1781_vm5 = vcmp.eq.f32.partialorder %v3916_v19, 0.0  ;;  %v1813_v18 = vmul.f32 %v2916_v45, %v3963_v33  ;;  %v1532_v1 = vmul.f32 %v2918_v0, %v3967_v57  ;;  %vm1807_vm6 = vcmp.eq.f32.partialorder %v3970_v61, inf }
 0x1bd   : > { %v1550_v26 = vand.u32 2147483648, %v4035_v41  ;;  %2929 = vrsqrt.f32 %v4038_v43  ;;  %vm1814_vm7 = vcmp.eq.f32.partialorder %v3963_v33, inf  ;;  %v1806_v3 = vmul.f32 %v2920_v2, %v3970_v61 }
 0x1be   : > { %v1824_v24 = vand.u32 2147483648, %v4038_v43  ;;  %2931 = vtanh.f32 %v1560_v36  ;;  %v1783_v59 = vsel %vm1781_vm5, %v1782_v54, %v1780_v62  ;;  %v1534_v16 = vsel %vm1533_vm15, %v3967_v57, %v1532_v1 }
 0x1bf   : > { %v1787_v27 = vsel %vm1786_vm11, %v3905_v8, %v3989_v20  ;;  %vm1788_vm8 = vcmp.eq.f32.partialorder %v3905_v8, 0.0  ;;  %v1833_v28 = vsub.f32 %v3654_v48, %v1783_v59  ;;  %vm1547_vm9 = vcmp.eq.f32.partialorder %v4035_v41, inf }
 0x1c0   : > { %v1790_v38 = vsel %vm1788_vm8, %v1789_v42, %v1787_v27  ;;  %v1523_v19 = vsel %vm1521_vm13, %v1522_v17, %v1520_v34  ;;  %v1530_v54 = vsel %vm1528_vm12, %v1529_v56, %v1527_v40  ;;  %v1794_v20 = vsel %vm1793_vm14, %v3942_v35, %v1792_v46 }
 0x1c1   : > { %vm1556_vm10 = vcmp.eq.f32.partialorder %v4006_v29, 0.0  ;;  %vm1549_vm11 = vcmp.eq.f32.partialorder %v4035_v41, 0.0  ;;  %v1834_v8 = vsub.f32 %v3654_v48, %v1790_v38  ;;  %2933 = vtanh.f32 %v1833_v28  ;;  %v2922_v17 = vpop.eup %2921 }
 0x1c2   : > { %v1561_v42 = vsub.f32 %v3654_v48, %v1523_v19  ;;  %v1562_v53 = vsub.f32 %v3654_v48, %v1530_v54  ;;  %vm1821_vm13 = vcmp.eq.f32.partialorder %v4038_v43, inf  ;;  %vm1795_vm12 = vcmp.eq.f32.partialorder %v3942_v35, 0.0  ;;  %v2924_v55 = vpop.eup %2923 }
 0x1c3   : > { %v1801_v39 = vsel %vm1800_vm0, %v3928_v15, %v1799_v11  ;;  %vm1802_vm14 = vcmp.eq.f32.partialorder %v3928_v15, 0.0  ;;  %v1537_v56 = vsel %vm1535_vm1, %v1536_v21, %v1534_v16  ;;  %v1553_v12 = vmul.f32 %v2922_v17, %v4006_v29 }
 0x1c4   : > { %vm1828_vm15 = vcmp.eq.f32.partialorder %v4009_v30, inf  ;;  %2935 = vtanh.f32 %v1834_v8  ;;  %v1797_v47 = vsel %vm1795_vm12, %v1796_v14, %v1794_v20  ;;  %v1804_v10 = vsel %vm1802_vm14, %v1803_v50, %v1801_v39  ;;  %v2926_v23 = vpop.eup %2925 }
 0x1c5   : > { %v1827_v7 = vmul.f32 %v2924_v55, %v4009_v30  ;;  %2937 = vtanh.f32 %v1561_v42  ;;  %v1835_v58 = vsub.f32 %v3654_v48, %v1797_v47  ;;  %v1836_v57 = vsub.f32 %v3654_v48, %v1804_v10  ;;  %v2928_v50 = vpop.eup %2927 }
 0x1c6   : > { %v1555_v21 = vsel %vm1554_vm4, %v4006_v29, %v1553_v12  ;;  %2939 = vtanh.f32 %v1562_v53  ;;  %v1544_v35 = vsel %vm1542_vm3, %v1543_v25, %v1541_v5  ;;  %v1563_v15 = vsub.f32 %v3654_v48, %v1537_v56 }
 0x1c7   : > { %v1575_v14 = vadd.f32 %v2926_v23, %v3840_v13  ;;  %2941 = vtanh.f32 %v1835_v58  ;;  %v1564_v40 = vsub.f32 %v3654_v48, %v1544_v35  ;;  %v1808_v11 = vsel %vm1807_vm6, %v3970_v61, %v1806_v3  ;;  %v2930_v60 = vpop.eup %2929 }
 0x1c8   : > { %v1546_v34 = vmul.f32 %v2928_v50, %v4035_v41  ;;  %2943 = vtanh.f32 %v1836_v57  ;;  %vm1809_vm0 = vcmp.eq.f32.partialorder %v3970_v61, 0.0  ;;  %v1815_v4 = vsel %vm1814_vm7, %v3963_v33, %v1813_v18  ;;  %v2932_v25 = vpop.eup %2931  ;;  %v1858_v57 = vld [vmem:[%s4199_s4 + $0x8] sm:$0xff] }
 0x1c9   : > { %v1820_v13 = vmul.f32 %v2930_v60, %v4038_v43  ;;  %2945 = vtanh.f32 %v1563_v15  ;;  %v1811_v36 = vsel %vm1809_vm0, %v1810_v22, %v1808_v11  ;;  %vm1816_vm1 = vcmp.eq.f32.partialorder %v3963_v33, 0.0 }
 0x1ca   : > { %v1548_v45 = vsel %vm1547_vm9, %v4035_v41, %v1546_v34  ;;  %v1576_v46 = vadd.f32 %v2932_v25, %v3852_v51  ;;  %2947 = vtanh.f32 %v1564_v40  ;;  %v1818_v62 = vsel %vm1816_vm1, %v1817_v6, %v1815_v4 }
 0x1cb   : > { %v1837_v0 = vsub.f32 %v3654_v48, %v1811_v36  ;;  %v1838_v5 = vsub.f32 %v3654_v48, %v1818_v62  ;;  %v1551_v61 = vsel %vm1549_vm11, %v1550_v26, %v1548_v45  ;;  %v1558_v22 = vsel %vm1556_vm10, %v1557_v52, %v1555_v21  ;;  %v2934_v2 = vpop.eup %2933 }
 0x1cc   : > { %v1565_v51 = vsub.f32 %v3654_v48, %v1551_v61  ;;  %v1566_v33 = vsub.f32 %v3654_v48, %v1558_v22  ;;  %v1822_v6 = vsel %vm1821_vm13, %v4038_v43, %v1820_v13  ;;  %vm1823_vm3 = vcmp.eq.f32.partialorder %v4038_v43, 0.0 }
 0x1cd   : > { %v1849_v18 = vadd.f32 %v2934_v2, %v1575_v14  ;;  %2949 = vtanh.f32 %v1837_v0  ;;  %v1825_v41 = vsel %vm1823_vm3, %v1824_v24, %v1822_v6  ;;  %v1829_v29 = vsel %vm1828_vm15, %v4009_v30, %v1827_v7 }
 0x1ce   : > { %v2936_v52 = vpop.eup %2935  ;;  %2951 = vtanh.f32 %v1838_v5  ;;  %vm1830_vm4 = vcmp.eq.f32.partialorder %v4009_v30, 0.0  ;;  %v1839_v1 = vsub.f32 %v3654_v48, %v1825_v41 }
 0x1cf   : > { %v2938_v26 = vpop.eup %2937  ;;  %v1850_v3 = vadd.f32 %v2936_v52, %v1576_v46  ;;  %2953 = vtanh.f32 %v1565_v51  ;;  %v1832_v59 = vsel %vm1830_vm4, %v1831_v63, %v1829_v29 }
 0x1d0   : > { %v2940_v16 = vpop.eup %2939  ;;  %v1577_v43 = vadd.f32 %v2938_v26, %v3874_v37  ;;  %2955 = vtanh.f32 %v1566_v33  ;;  %v1840_v24 = vsub.f32 %v3654_v48, %v1832_v59 }
 0x1d1   : > { %v2942_v27 = vpop.eup %2941  ;;  %v2774_v28 = vpack.c.bf16 %v1850_v3, %v1849_v18  ;;  %v1578_v38 = vadd.f32 %v2940_v16, %v3876_v9  ;;  %2957 = vtanh.f32 %v1839_v1 }
 0x1d2   : > { %v2944_v19 = vpop.eup %2943  ;;  %v1851_v54 = vadd.f32 %v2942_v27, %v1577_v43  ;;  %2959 = vtanh.f32 %v1840_v24 }
 0x1d3   : > { %v2946_v20 = vpop.eup %2945  ;;  %2775 = vmatprep.subr.bf16.mxu0 %v2774_v28  ;;  %v1852_v8 = vadd.f32 %v2944_v19, %v1578_v38 }
 0x1d4   : > { %v2948_v42 = vpop.eup %2947  ;;  %2777 = vmatpush3.bf16.msra.mxu0 %v2774_v28  ;;  %v1579_v30 = vadd.f32 %v2946_v20, %v3878_v31 }
 0x1d5   : > { %v2778_v63 = vpack.c.bf16 %v1852_v8, %v1851_v54  ;;  %v1580_v37 = vadd.f32 %v2948_v42, %v3880_v32 }
 0x1d7   : > { %v2950_v53 = vpop.eup %2949  ;;  %2779 = vmatprep.subr.bf16.mxu0 %v2778_v63 }
 0x1d8   : > { %v2952_v48 = vpop.eup %2951  ;;  %2781 = vmatpush3.bf16.msra.mxu0 %v2778_v63  ;;  %v1853_v17 = vadd.f32 %v2950_v53, %v1579_v30 }
 0x1d9   : > { %v2954_v9 = vpop.eup %2953  ;;  %v1854_v39 = vadd.f32 %v2952_v48, %v1580_v37 }
 0x1da   : > { %v2956_v56 = vpop.eup %2955  ;;  %v1581_v55 = vadd.f32 %v2954_v9, %v3882_v49 }
 0x1db   : > { %v2958_v12 = vpop.eup %2957  ;;  %v2782_v47 = vpack.c.bf16 %v1854_v39, %v1853_v17  ;;  %v1582_v10 = vadd.f32 %v2956_v56, %v3891_v44 }
 0x1dc   : > { %v2960_v7 = vpop.eup %2959  ;;  %v1855_v31 = vadd.f32 %v2958_v12, %v1581_v55 }
 0x1dd   : > { %2783 = vmatprep.subr.bf16.mxu0 %v2782_v47  ;;  %v1856_v58 = vadd.f32 %v2960_v7, %v1582_v10 }
 0x1de   : > { %2785 = vmatpush3.bf16.msra.mxu0 %v2782_v47 }
 0x1df   : > { %v2786_v32 = vpack.c.bf16 %v1856_v58, %v1855_v31 }
 0x1e1   : > { %2787 = vmatprep.subr.bf16.mxu0 %v2786_v32 }
 0x1e2   : > { %2789 = vmatpush3.bf16.msra.mxu0 %v2786_v32 }
 0x1e5   : > { %2580 = vmatmul.mubr.msk.f32.vlgmr.msra.gmra.mrb[16].mxu0 %vm1859_vm2, %v1858_v57 }
 0x2b8   : > { %v2581_v49 = vpop.f32.mrb[16].mxu0  ;;  %1953 = sbr.rel (!%p3087_p6) target bundleno = 711 (0x2c7), region = 124 }
 0x2b9   : > { %v1942_v23 = vmul.f32 0.03125, %v2581_v49  ;;  %v1932_v21 = vpop.f32.mrb[17].mxu0 }
 0x2ba   : > { %v1941_v35 = vmul.f32 0.03125, %v1932_v21 }
 0x2bb   : > { %v1944_v44 = vadd.f32 0.5, %v1942_v23 }
 0x2bc   : > { %v1943_v15 = vadd.f32 0.5, %v1941_v35 }
 0x2bd   : > { %1946 = vst [vmem:[%s671_s21 + $0x8] sm:$0xff] %v1944_v44 }
 0x2be   : > { %1945 = vst [vmem:[%s671_s21] sm:$0xff] %v1943_v15 }
 0x2c4   : > { %v1990_v14 = vld [vmem:[%s671_s21 + $0x8] sm:$0xff] }
 0x2c5   : > { %v1988_v50 = vld [vmem:[%s671_s21] sm:$0xff]  ;;  %1991 = vst [vmem:[%s1958_s6 + $0x10] sm:$0xff] %v1990_v14 }
 0x2c6   : > { %1989 = vst [vmem:[%s1958_s6] sm:$0xff] %v1988_v50 }
 0x2c7 PF: > { %s19_s9 = sadd.s32 1, %s2999_s9   ;;  %s4207_s28 = smov %s2987_s29 }
 0x2c8   : > { %p16_p11 = scmp.ge.s32.totalorder %s19_s9, 4   ;;  %s4208_s29 = smov %s3092_s14 }
 0x2c9   : > { %s4209_s30 = smov %s2995_s8  ;;  %s4210_s8 = smov %s4212_s5 }
 0x2ca   :  { %18 = sbr.rel (!%p16_p11) target bundleno = 6 (0x6), region = 213 }

</bundles_post_ra>
